<compile_context>
chip_gen: v7x
topology: tpu7x:2x2x1
jax: 0.10.0
libtpu: 0.0.40
codegen_flags: <defaults>
</compile_context>

<pallas_src>
import math
import functools

import jax
import jax.numpy as jnp
from jax.experimental import pallas as pl
from jax.experimental.pallas import tpu as pltpu

BN_EPS = 1e-5

_PARALLEL = pltpu.CompilerParams(dimension_semantics=("parallel",))


# ----------------------------- Pallas kernels ------------------------------

def _stem_conv_kernel(w_ref, p_ref, s_ref, b_ref, raw_ref, act_ref):
    # out_raw = W @ patches ; out_act = relu(bn(out_raw))  (bn of block1)
    y = jnp.dot(w_ref[...], p_ref[...], preferred_element_type=jnp.float32)
    raw_ref[...] = y
    act_ref[...] = jnp.maximum(y * s_ref[...] + b_ref[...], 0.0)


def _conv_bn_relu_kernel(w_ref, p_ref, s_ref, b_ref, o_ref):
    # out = relu(bn(W @ patches))
    y = jnp.dot(w_ref[...], p_ref[...], preferred_element_type=jnp.float32)
    o_ref[...] = jnp.maximum(y * s_ref[...] + b_ref[...], 0.0)


def _conv_res_time_bn_relu_kernel(w_ref, p_ref, res_ref, pe_ref, tw_ref, tb_ref,
                                  seg_ref, s_ref, b_ref, o_ref):
    # out = relu(bn_next( W @ patches + residual + broadcast(relu(Wt @ pe + bt)) ))
    y = jnp.dot(w_ref[...], p_ref[...], preferred_element_type=jnp.float32)
    y = y + res_ref[...]
    # fused time_ffn: (C1, d_model) @ (d_model, B) -> (C1, B)
    tfeat = jnp.maximum(
        jnp.dot(tw_ref[...], pe_ref[...], preferred_element_type=jnp.float32)
        + tb_ref[...], 0.0)
    # broadcast each per-image column over that image's spatial lanes via the
    # constant 0/1 segment matrix: (C1, B) @ (B, M) -> (C1, M)
    y = y + jnp.dot(tfeat, seg_ref[...], preferred_element_type=jnp.float32)
    o_ref[...] = jnp.maximum(y * s_ref[...] + b_ref[...], 0.0)


def _conv_shortcut_bn_relu_kernel(w_ref, p_ref, ws_ref, ps_ref, s_ref, b_ref, o_ref):
    # out = relu(bn_next( W @ patches + Wshort @ strided_input ))
    y = jnp.dot(w_ref[...], p_ref[...], preferred_element_type=jnp.float32)
    y = y + jnp.dot(ws_ref[...], ps_ref[...], preferred_element_type=jnp.float32)
    o_ref[...] = jnp.maximum(y * s_ref[...] + b_ref[...], 0.0)


def _pool_fc_kernel(x_ref, avg_ref, fw_ref, fb_ref, o_ref):
    # pooled (C, B) = x (C, M) @ avg (M, B) ; logits^T = fcW (ncls, C) @ pooled + b
    pooled = jnp.dot(x_ref[...], avg_ref[...], preferred_element_type=jnp.float32)
    o_ref[...] = jnp.dot(fw_ref[...], pooled, preferred_element_type=jnp.float32) + fb_ref[...]


# --------------------------- pallas_call wrappers ----------------------------

def _mgrid(m):
    """Lane-dense blocking of the spatial (lane) axis."""
    if m > 256 and m % 256 == 0:
        return 256, m // 256
    return m, 1


def _full(shape):
    # full-array block, replicated across the (tiny) grid
    return pl.BlockSpec(tuple(shape), lambda *_: (0,) * len(shape))


def _lane_blocked(rows, bm):
    # block only along the lane/spatial axis
    return pl.BlockSpec((rows, bm), lambda j: (0, j))


def stem_conv(w, patches, scale, bias):
    cout = w.shape[0]
    k, m = patches.shape
    bm, g = _mgrid(m)
    return pl.pallas_call(
        _stem_conv_kernel,
        out_shape=(jax.ShapeDtypeStruct((cout, m), jnp.float32),
                   jax.ShapeDtypeStruct((cout, m), jnp.float32)),
        grid=(g,),
        in_specs=[_full(w.shape), _lane_blocked(k, bm),
                  _full(scale.shape), _full(bias.shape)],
        out_specs=(_lane_blocked(cout, bm), _lane_blocked(cout, bm)),
        compiler_params=_PARALLEL,
    )(w, patches, scale, bias)


def conv_bn_relu(w, patches, scale, bias):
    cout = w.shape[0]
    k, m = patches.shape
    bm, g = _mgrid(m)
    return pl.pallas_call(
        _conv_bn_relu_kernel,
        out_shape=jax.ShapeDtypeStruct((cout, m), jnp.float32),
        grid=(g,),
        in_specs=[_full(w.shape), _lane_blocked(k, bm),
                  _full(scale.shape), _full(bias.shape)],
        out_specs=_lane_blocked(cout, bm),
        compiler_params=_PARALLEL,
    )(w, patches, scale, bias)


def conv_res_time_bn_relu(w, patches, res, peT, time_wT, time_bT, seg, scale, bias):
    cout = w.shape[0]
    k, m = patches.shape
    batch = seg.shape[0]
    bm, g = _mgrid(m)
    return pl.pallas_call(
        _conv_res_time_bn_relu_kernel,
        out_shape=jax.ShapeDtypeStruct((cout, m), jnp.float32),
        grid=(g,),
        in_specs=[_full(w.shape), _lane_blocked(k, bm), _lane_blocked(cout, bm),
                  _full(peT.shape), _full(time_wT.shape), _full(time_bT.shape),
                  _lane_blocked(batch, bm), _full(scale.shape), _full(bias.shape)],
        out_specs=_lane_blocked(cout, bm),
        compiler_params=_PARALLEL,
    )(w, patches, res, peT, time_wT, time_bT, seg, scale, bias)


def conv_shortcut_bn_relu(w, patches, w_short, p_short, scale, bias):
    cout = w.shape[0]
    k, m = patches.shape
    cin_s = p_short.shape[0]
    bm, g = _mgrid(m)
    return pl.pallas_call(
        _conv_shortcut_bn_relu_kernel,
        out_shape=jax.ShapeDtypeStruct((cout, m), jnp.float32),
        grid=(g,),
        in_specs=[_full(w.shape), _lane_blocked(k, bm),
                  _full(w_short.shape), _lane_blocked(cin_s, bm),
                  _full(scale.shape), _full(bias.shape)],
        out_specs=_lane_blocked(cout, bm),
        compiler_params=_PARALLEL,
    )(w, patches, w_short, p_short, scale, bias)


def pool_fc(x_act, avg, fc_wT, fc_bT):
    n_cls = fc_wT.shape[0]
    batch = avg.shape[1]
    return pl.pallas_call(
        _pool_fc_kernel,
        out_shape=jax.ShapeDtypeStruct((n_cls, batch), jnp.float32),
        grid=(1,),
        in_specs=[_full(x_act.shape), _full(avg.shape),
                  _full(fc_wT.shape), _full(fc_bT.shape)],
        out_specs=_full((n_cls, batch)),
    )(x_act, avg, fc_wT, fc_bT)


# ------------------------------- JAX-side glue -------------------------------

def im2col_cm(x_cm, batch, h, w, k, stride, pad):
    """x_cm: (C, B*H*W) channels-major -> patches (C*k*k, B*Ho*Wo)."""
    c = x_cm.shape[0]
    x4 = x_cm.reshape(c, batch, h, w)
    xp = jnp.pad(x4, ((0, 0), (0, 0), (pad, pad), (pad, pad)))
    ho = (h + 2 * pad - k) // stride + 1
    wo = (w + 2 * pad - k) // stride + 1
    taps = []
    for kh in range(k):
        for kw in range(k):
            taps.append(xp[:, :, kh:kh + ho * stride:stride,
                           kw:kw + wo * stride:stride])
    st = jnp.stack(taps, axis=1)                      # (C, k*k, B, Ho, Wo)
    return st.reshape(c * k * k, batch * ho * wo), ho, wo


def subsample_cm(x_cm, batch, h, w, stride):
    """1x1-conv stride-s input: spatial subsample of a channels-major map."""
    c = x_cm.shape[0]
    x4 = x_cm.reshape(c, batch, h, w)
    sub = x4[:, :, ::stride, ::stride]
    ho = (h - 1) // stride + 1
    wo = (w - 1) // stride + 1
    return sub.reshape(c, batch * ho * wo), ho, wo


# ------------------------------ parameter init -------------------------------

def _conv_weight(key, cin, cout, k):
    # kaiming_normal_(mode='fan_out', nonlinearity='relu'); (Cout, Cin*k*k)
    std = math.sqrt(2.0 / (k * k * cout))
    w = jax.random.normal(key, (cout, cin, k, k), jnp.float32) * std
    return w.reshape(cout, cin * k * k)


def _bn_fold(c):
    # eval-mode fold of freshly-initialized BatchNorm2d
    gamma = jnp.ones((c,), jnp.float32)
    beta = jnp.zeros((c,), jnp.float32)
    running_mean = jnp.zeros((c,), jnp.float32)
    running_var = jnp.ones((c,), jnp.float32)
    scale = gamma / jnp.sqrt(running_var + BN_EPS)
    bias = beta - running_mean * scale
    return scale.reshape(c, 1), bias.reshape(c, 1)


def _make_block_params(key, cin, cout, equal):
    k1, k2, k3 = jax.random.split(key, 3)
    p = {}
    p['bn1_scale'], p['bn1_bias'] = _bn_fold(cin)
    p['w1'] = _conv_weight(k1, cin, cout, 3)
    p['bn2_scale'], p['bn2_bias'] = _bn_fold(cout)
    p['w2'] = _conv_weight(k2, cout, cout, 3)
    if not equal:
        p['w_short'] = _conv_weight(k3, cin, cout, 1)
    return p


def get_freq_encoding(max_len, d_model):
    position = jnp.arange(max_len, dtype=jnp.float32)[:, None]
    div_term = 2.0 * math.pi / jnp.arange(2, d_model + 1, 2, dtype=jnp.float32)
    angles = position * div_term                       # (max_len, d_model//2)
    pe = jnp.zeros((max_len, d_model), jnp.float32)
    pe = pe.at[:, 0::2].set(jnp.sin(angles))
    pe = pe.at[:, 1::2].set(jnp.cos(angles))
    return pe


def init_params(key, num_classes=10, base_chans=4, input_chans=3,
                widen_factor=1, d_model=128, max_len=5000):
    nC = [base_chans, base_chans * widen_factor,
          2 * base_chans * widen_factor, 4 * base_chans * widen_factor]
    keys = jax.random.split(key, 8)
    p = {}
    p['conv1_w'] = _conv_weight(keys[0], input_chans, nC[0], 3)
    p['block1'] = _make_block_params(keys[1], nC[0], nC[1], equal=(nC[0] == nC[1]))
    p['block2'] = _make_block_params(keys[2], nC[1], nC[2], equal=False)
    p['block3'] = _make_block_params(keys[3], nC[2], nC[3], equal=False)
    p['bn_final_scale'], p['bn_final_bias'] = _bn_fold(nC[3])
    # fc: Linear(nC[3], num_classes)   (weight kept in torch (out,in) layout)
    p['fc_wT'] = jax.random.normal(keys[4], (num_classes, nC[3]), jnp.float32) / math.sqrt(nC[3])
    p['fc_bT'] = jnp.zeros((num_classes, 1), jnp.float32)      # zeroed in init loop
    # time_ffn: Linear(d_model, nC[1]) + ReLU
    p['time_wT'] = jax.random.normal(keys[5], (nC[1], d_model), jnp.float32) / math.sqrt(d_model)
    p['time_bT'] = jnp.zeros((nC[1], 1), jnp.float32)          # zeroed in init loop
    p['pe'] = get_freq_encoding(max_len, d_model)
    return p


# --------------------------------- forward ----------------------------------

def forward(params, x_nchw, t_idx):
    """x_nchw: (B, Cin, H, W) like the PyTorch module; t_idx: (B,) int time indices."""
    batch, cin, h, w = x_nchw.shape
    x_cm = jnp.transpose(x_nchw, (1, 0, 2, 3)).reshape(cin, batch * h * w)
    x_cm = x_cm.astype(jnp.float32)

    # time encoding row gather (tiny; stays in XLA), transposed to (d_model, B)
    peT = params['pe'][t_idx].astype(jnp.float32).T

    b1, b2, b3 = params['block1'], params['block2'], params['block3']

    # --- stem conv1 (raw output kept for block1's identity residual) ---------
    p0, ho, wo = im2col_cm(x_cm, batch, h, w, 3, 1, 1)
    x_raw, x_act = stem_conv(params['conv1_w'], p0, b1['bn1_scale'], b1['bn1_bias'])

    # --- block1 (equalInOut, stride 1) ---------------------------------------
    p1, _, _ = im2col_cm(x_act, batch, ho, wo, 3, 1, 1)
    u1 = conv_bn_relu(b1['w1'], p1, b1['bn2_scale'], b1['bn2_bias'])
    p2, _, _ = im2col_cm(u1, batch, ho, wo, 3, 1, 1)
    # 0/1 segment matrix: broadcast per-image time feature over its spatial lanes
    seg1 = jnp.repeat(jnp.eye(batch, dtype=jnp.float32), ho * wo, axis=1)
    a2 = conv_res_time_bn_relu(b1['w2'], p2, x_raw, peT,
                               params['time_wT'], params['time_bT'], seg1,
                               b2['bn1_scale'], b2['bn1_bias'])

    # --- block2 (stride 2, conv shortcut) ------------------------------------
    p3, h2, w2 = im2col_cm(a2, batch, ho, wo, 3, 2, 1)
    u2 = conv_bn_relu(b2['w1'], p3, b2['bn2_scale'], b2['bn2_bias'])
    p4, _, _ = im2col_cm(u2, batch, h2, w2, 3, 1, 1)
    ps2, _, _ = subsample_cm(a2, batch, ho, wo, 2)
    a3 = conv_shortcut_bn_relu(b2['w2'], p4, b2['w_short'], ps2,
                               b3['bn1_scale'], b3['bn1_bias'])

    # --- block3 (stride 2, conv shortcut), epilogue = final BN+ReLU ----------
    p5, h3, w3 = im2col_cm(a3, batch, h2, w2, 3, 2, 1)
    u3 = conv_bn_relu(b3['w1'], p5, b3['bn2_scale'], b3['bn2_bias'])
    p6, _, _ = im2col_cm(u3, batch, h3, w3, 3, 1, 1)
    ps3, _, _ = subsample_cm(a3, batch, h2, w2, 2)
    y = conv_shortcut_bn_relu(b3['w2'], p6, b3['w_short'], ps3,
                              params['bn_final_scale'], params['bn_final_bias'])

    # --- global average pool + fc (single fused kernel) ----------------------
    avg = jnp.repeat(jnp.eye(batch, dtype=jnp.float32), h3 * w3, axis=0) / float(h3 * w3)
    logitsT = pool_fc(y, avg, params['fc_wT'], params['fc_bT'])   # (num_classes, B)
    return logitsT.T                                              # (B, num_classes)


# ----------------------------------- main ------------------------------------

if __name__ == "__main__":
    key = jax.random.PRNGKey(0)
    pkey, xkey, tkey = jax.random.split(key, 3)

    params = init_params(pkey)

    # small shapes consistent with the module: batch=2, input_chans=3, 16x16 image
    x = jax.random.normal(xkey, (2, 3, 16, 16), jnp.float32)   # NCHW, like PyTorch
    t = jax.random.randint(tkey, (2,), 0, 5000, dtype=jnp.int32)

    fwd = jax.jit(functools.partial(forward, params))
    logits = fwd(x, t)
    jax.block_until_ready(logits)

    assert logits.shape == (2, 10), logits.shape
    assert bool(jnp.all(jnp.isfinite(logits)))
    print("KERNEL_OK")
</pallas_src>

<mosaic_0001>
module attributes {stable_mosaic.version = 11 : i64} {
  func.func @_stem_conv_kernel(%arg0: i32, %arg1: memref<4x27xf32, #tpu.memory_space<vmem>>, %arg2: memref<27x256xf32, #tpu.memory_space<vmem>>, %arg3: memref<4x1xf32, #tpu.memory_space<vmem>>, %arg4: memref<4x1xf32, #tpu.memory_space<vmem>>, %arg5: memref<4x256xf32, #tpu.memory_space<vmem>>, %arg6: memref<4x256xf32, #tpu.memory_space<vmem>>) attributes {dimension_semantics = [#tpu.dimension_semantics<parallel>], iteration_bounds = array<i64: 2>, scalar_prefetch = 0 : i64, scratch_operands = 0 : i64, tpu.core_type = #tpu.core_type<tc>, window_params = [{pipeline_mode = #tpu.pipeline_mode<synchronous>, transform_indices = @transform_0, window_bounds = array<i64: 4, 27>}, {transform_indices = @transform_1, window_bounds = array<i64: 27, 256>}, {pipeline_mode = #tpu.pipeline_mode<synchronous>, transform_indices = @transform_2, window_bounds = array<i64: 4, 1>}, {pipeline_mode = #tpu.pipeline_mode<synchronous>, transform_indices = @transform_3, window_bounds = array<i64: 4, 1>}, {transform_indices = @transform_4, window_bounds = array<i64: 4, 256>}, {transform_indices = @transform_5, window_bounds = array<i64: 4, 256>}]} {
    %c0 = arith.constant 0 : index
    %c0_0 = arith.constant 0 : index
    %0 = vector.load %arg1[%c0, %c0_0] : memref<4x27xf32, #tpu.memory_space<vmem>>, vector<4x27xf32>
    %c0_1 = arith.constant 0 : index
    %c0_2 = arith.constant 0 : index
    %1 = vector.load %arg2[%c0_1, %c0_2] : memref<27x256xf32, #tpu.memory_space<vmem>>, vector<27x256xf32>
    %cst = arith.constant dense<0.000000e+00> : vector<4x256xf32>
    %2 = tpu.matmul %0, %1, %cst {dimension_numbers = #tpu.dot_dimension_numbers<[1], [0], [0], [1], [0, 0, 1, 1], [], []>} : vector<4x27xf32>, vector<27x256xf32>, vector<4x256xf32> -> vector<4x256xf32>
    %c0_3 = arith.constant 0 : index
    %c0_4 = arith.constant 0 : index
    %3 = vector.load %arg5[%c0_3, %c0_4] : memref<4x256xf32, #tpu.memory_space<vmem>>, vector<4x256xf32>
    tpu.vector_store %arg5[%c0_3, %c0_4], %2 {strides = array<i32>} : memref<4x256xf32, #tpu.memory_space<vmem>>, vector<4x256xf32>,
    %c0_5 = arith.constant 0 : index
    %c0_6 = arith.constant 0 : index
    %4 = vector.load %arg3[%c0_5, %c0_6] : memref<4x1xf32, #tpu.memory_space<vmem>>, vector<4x1xf32>
    %5 = vector.broadcast %4 : vector<4x1xf32> to vector<4x256xf32>
    %6 = arith.mulf %2, %5 : vector<4x256xf32>
    %c0_7 = arith.constant 0 : index
    %c0_8 = arith.constant 0 : index
    %7 = vector.load %arg4[%c0_7, %c0_8] : memref<4x1xf32, #tpu.memory_space<vmem>>, vector<4x1xf32>
    %8 = vector.broadcast %7 : vector<4x1xf32> to vector<4x256xf32>
    %9 = arith.addf %6, %8 : vector<4x256xf32>
    %cst_9 = arith.constant 0.000000e+00 : f32
    %10 = vector.broadcast %cst_9 : f32 to vector<4x256xf32>
    %11 = arith.maximumf %9, %10 : vector<4x256xf32>
    %c0_10 = arith.constant 0 : index
    %c0_11 = arith.constant 0 : index
    %12 = vector.load %arg6[%c0_10, %c0_11] : memref<4x256xf32, #tpu.memory_space<vmem>>, vector<4x256xf32>
    tpu.vector_store %arg6[%c0_10, %c0_11], %11 {strides = array<i32>} : memref<4x256xf32, #tpu.memory_space<vmem>>, vector<4x256xf32>,
    return
  }
  func.func @transform_0(%arg0: i32) -> (i32, i32) {
    %c0_i32 = arith.constant 0 : i32
    %c0_i32_0 = arith.constant 0 : i32
    %c0_i32_1 = arith.constant 0 : i32
    return %c0_i32, %c0_i32_0 : i32, i32
  }
  func.func @transform_1(%arg0: i32) -> (i32, i32) {
    %c0_i32 = arith.constant 0 : i32
    %c0_i32_0 = arith.constant 0 : i32
    return %c0_i32, %arg0 : i32, i32
  }
  func.func @transform_2(%arg0: i32) -> (i32, i32) {
    %c0_i32 = arith.constant 0 : i32
    %c0_i32_0 = arith.constant 0 : i32
    %c0_i32_1 = arith.constant 0 : i32
    return %c0_i32, %c0_i32_0 : i32, i32
  }
  func.func @transform_3(%arg0: i32) -> (i32, i32) {
    %c0_i32 = arith.constant 0 : i32
    %c0_i32_0 = arith.constant 0 : i32
    %c0_i32_1 = arith.constant 0 : i32
    return %c0_i32, %c0_i32_0 : i32, i32
  }
  func.func @transform_4(%arg0: i32) -> (i32, i32) {
    %c0_i32 = arith.constant 0 : i32
    %c0_i32_0 = arith.constant 0 : i32
    return %c0_i32, %arg0 : i32, i32
  }
  func.func @transform_5(%arg0: i32) -> (i32, i32) {
    %c0_i32 = arith.constant 0 : i32
    %c0_i32_0 = arith.constant 0 : i32
    return %c0_i32, %arg0 : i32, i32
  }
}

module attributes {stable_mosaic.version = 11 : i64} {
  func.func @_conv_bn_relu_kernel(%arg0: i32, %arg1: memref<4x36xf32, #tpu.memory_space<vmem>>, %arg2: memref<36x256xf32, #tpu.memory_space<vmem>>, %arg3: memref<4x1xf32, #tpu.memory_space<vmem>>, %arg4: memref<4x1xf32, #tpu.memory_space<vmem>>, %arg5: memref<4x256xf32, #tpu.memory_space<vmem>>) attributes {dimension_semantics = [#tpu.dimension_semantics<parallel>], iteration_bounds = array<i64: 2>, scalar_prefetch = 0 : i64, scratch_operands = 0 : i64, tpu.core_type = #tpu.core_type<tc>, window_params = [{pipeline_mode = #tpu.pipeline_mode<synchronous>, transform_indices = @transform_0, window_bounds = array<i64: 4, 36>}, {transform_indices = @transform_1, window_bounds = array<i64: 36, 256>}, {pipeline_mode = #tpu.pipeline_mode<synchronous>, transform_indices = @transform_2, window_bounds = array<i64: 4, 1>}, {pipeline_mode = #tpu.pipeline_mode<synchronous>, transform_indices = @transform_3, window_bounds = array<i64: 4, 1>}, {transform_indices = @transform_4, window_bounds = array<i64: 4, 256>}]} {
    %c0 = arith.constant 0 : index
    %c0_0 = arith.constant 0 : index
    %0 = vector.load %arg1[%c0, %c0_0] : memref<4x36xf32, #tpu.memory_space<vmem>>, vector<4x36xf32>
    %c0_1 = arith.constant 0 : index
    %c0_2 = arith.constant 0 : index
    %1 = vector.load %arg2[%c0_1, %c0_2] : memref<36x256xf32, #tpu.memory_space<vmem>>, vector<36x256xf32>
    %cst = arith.constant dense<0.000000e+00> : vector<4x256xf32>
    %2 = tpu.matmul %0, %1, %cst {dimension_numbers = #tpu.dot_dimension_numbers<[1], [0], [0], [1], [0, 0, 1, 1], [], []>} : vector<4x36xf32>, vector<36x256xf32>, vector<4x256xf32> -> vector<4x256xf32>
    %c0_3 = arith.constant 0 : index
    %c0_4 = arith.constant 0 : index
    %3 = vector.load %arg3[%c0_3, %c0_4] : memref<4x1xf32, #tpu.memory_space<vmem>>, vector<4x1xf32>
    %4 = vector.broadcast %3 : vector<4x1xf32> to vector<4x256xf32>
    %5 = arith.mulf %2, %4 : vector<4x256xf32>
    %c0_5 = arith.constant 0 : index
    %c0_6 = arith.constant 0 : index
    %6 = vector.load %arg4[%c0_5, %c0_6] : memref<4x1xf32, #tpu.memory_space<vmem>>, vector<4x1xf32>
    %7 = vector.broadcast %6 : vector<4x1xf32> to vector<4x256xf32>
    %8 = arith.addf %5, %7 : vector<4x256xf32>
    %cst_7 = arith.constant 0.000000e+00 : f32
    %9 = vector.broadcast %cst_7 : f32 to vector<4x256xf32>
    %10 = arith.maximumf %8, %9 : vector<4x256xf32>
    %c0_8 = arith.constant 0 : index
    %c0_9 = arith.constant 0 : index
    %11 = vector.load %arg5[%c0_8, %c0_9] : memref<4x256xf32, #tpu.memory_space<vmem>>, vector<4x256xf32>
    tpu.vector_store %arg5[%c0_8, %c0_9], %10 {strides = array<i32>} : memref<4x256xf32, #tpu.memory_space<vmem>>, vector<4x256xf32>,
    return
  }
  func.func @transform_0(%arg0: i32) -> (i32, i32) {
    %c0_i32 = arith.constant 0 : i32
    %c0_i32_0 = arith.constant 0 : i32
    %c0_i32_1 = arith.constant 0 : i32
    return %c0_i32, %c0_i32_0 : i32, i32
  }
  func.func @transform_1(%arg0: i32) -> (i32, i32) {
    %c0_i32 = arith.constant 0 : i32
    %c0_i32_0 = arith.constant 0 : i32
    return %c0_i32, %arg0 : i32, i32
  }
  func.func @transform_2(%arg0: i32) -> (i32, i32) {
    %c0_i32 = arith.constant 0 : i32
    %c0_i32_0 = arith.constant 0 : i32
    %c0_i32_1 = arith.constant 0 : i32
    return %c0_i32, %c0_i32_0 : i32, i32
  }
  func.func @transform_3(%arg0: i32) -> (i32, i32) {
    %c0_i32 = arith.constant 0 : i32
    %c0_i32_0 = arith.constant 0 : i32
    %c0_i32_1 = arith.constant 0 : i32
    return %c0_i32, %c0_i32_0 : i32, i32
  }
  func.func @transform_4(%arg0: i32) -> (i32, i32) {
    %c0_i32 = arith.constant 0 : i32
    %c0_i32_0 = arith.constant 0 : i32
    return %c0_i32, %arg0 : i32, i32
  }
}

module attributes {stable_mosaic.version = 11 : i64} {
  func.func @_conv_res_time_bn_relu_kernel(%arg0: i32, %arg1: memref<4x36xf32, #tpu.memory_space<vmem>>, %arg2: memref<36x256xf32, #tpu.memory_space<vmem>>, %arg3: memref<4x256xf32, #tpu.memory_space<vmem>>, %arg4: memref<128x2xf32, #tpu.memory_space<vmem>>, %arg5: memref<4x128xf32, #tpu.memory_space<vmem>>, %arg6: memref<4x1xf32, #tpu.memory_space<vmem>>, %arg7: memref<2x256xf32, #tpu.memory_space<vmem>>, %arg8: memref<4x1xf32, #tpu.memory_space<vmem>>, %arg9: memref<4x1xf32, #tpu.memory_space<vmem>>, %arg10: memref<4x256xf32, #tpu.memory_space<vmem>>) attributes {dimension_semantics = [#tpu.dimension_semantics<parallel>], iteration_bounds = array<i64: 2>, scalar_prefetch = 0 : i64, scratch_operands = 0 : i64, tpu.core_type = #tpu.core_type<tc>, window_params = [{pipeline_mode = #tpu.pipeline_mode<synchronous>, transform_indices = @transform_0, window_bounds = array<i64: 4, 36>}, {transform_indices = @transform_1, window_bounds = array<i64: 36, 256>}, {transform_indices = @transform_2, window_bounds = array<i64: 4, 256>}, {pipeline_mode = #tpu.pipeline_mode<synchronous>, transform_indices = @transform_3, window_bounds = array<i64: 128, 2>}, {pipeline_mode = #tpu.pipeline_mode<synchronous>, transform_indices = @transform_4, window_bounds = array<i64: 4, 128>}, {pipeline_mode = #tpu.pipeline_mode<synchronous>, transform_indices = @transform_5, window_bounds = array<i64: 4, 1>}, {transform_indices = @transform_6, window_bounds = array<i64: 2, 256>}, {pipeline_mode = #tpu.pipeline_mode<synchronous>, transform_indices = @transform_7, window_bounds = array<i64: 4, 1>}, {pipeline_mode = #tpu.pipeline_mode<synchronous>, transform_indices = @transform_8, window_bounds = array<i64: 4, 1>}, {transform_indices = @transform_9, window_bounds = array<i64: 4, 256>}]} {
    %c0 = arith.constant 0 : index
    %c0_0 = arith.constant 0 : index
    %0 = vector.load %arg1[%c0, %c0_0] : memref<4x36xf32, #tpu.memory_space<vmem>>, vector<4x36xf32>
    %c0_1 = arith.constant 0 : index
    %c0_2 = arith.constant 0 : index
    %1 = vector.load %arg2[%c0_1, %c0_2] : memref<36x256xf32, #tpu.memory_space<vmem>>, vector<36x256xf32>
    %cst = arith.constant dense<0.000000e+00> : vector<4x256xf32>
    %2 = tpu.matmul %0, %1, %cst {dimension_numbers = #tpu.dot_dimension_numbers<[1], [0], [0], [1], [0, 0, 1, 1], [], []>} : vector<4x36xf32>, vector<36x256xf32>, vector<4x256xf32> -> vector<4x256xf32>
    %c0_3 = arith.constant 0 : index
    %c0_4 = arith.constant 0 : index
    %3 = vector.load %arg3[%c0_3, %c0_4] : memref<4x256xf32, #tpu.memory_space<vmem>>, vector<4x256xf32>
    %4 = arith.addf %2, %3 : vector<4x256xf32>
    %c0_5 = arith.constant 0 : index
    %c0_6 = arith.constant 0 : index
    %5 = vector.load %arg5[%c0_5, %c0_6] : memref<4x128xf32, #tpu.memory_space<vmem>>, vector<4x128xf32>
    %c0_7 = arith.constant 0 : index
    %c0_8 = arith.constant 0 : index
    %6 = vector.load %arg4[%c0_7, %c0_8] : memref<128x2xf32, #tpu.memory_space<vmem>>, vector<128x2xf32>
    %cst_9 = arith.constant dense<0.000000e+00> : vector<4x2xf32>
    %7 = tpu.matmul %5, %6, %cst_9 {dimension_numbers = #tpu.dot_dimension_numbers<[1], [0], [0], [1], [0, 0, 1, 1], [], []>} : vector<4x128xf32>, vector<128x2xf32>, vector<4x2xf32> -> vector<4x2xf32>
    %c0_10 = arith.constant 0 : index
    %c0_11 = arith.constant 0 : index
    %8 = vector.load %arg6[%c0_10, %c0_11] : memref<4x1xf32, #tpu.memory_space<vmem>>, vector<4x1xf32>
    %9 = vector.broadcast %8 : vector<4x1xf32> to vector<4x2xf32>
    %10 = arith.addf %7, %9 : vector<4x2xf32>
    %cst_12 = arith.constant 0.000000e+00 : f32
    %11 = vector.broadcast %cst_12 : f32 to vector<4x2xf32>
    %12 = arith.maximumf %10, %11 : vector<4x2xf32>
    %c0_13 = arith.constant 0 : index
    %c0_14 = arith.constant 0 : index
    %13 = vector.load %arg7[%c0_13, %c0_14] : memref<2x256xf32, #tpu.memory_space<vmem>>, vector<2x256xf32>
    %cst_15 = arith.constant dense<0.000000e+00> : vector<4x256xf32>
    %14 = tpu.matmul %12, %13, %cst_15 {dimension_numbers = #tpu.dot_dimension_numbers<[1], [0], [0], [1], [0, 0, 1, 1], [], []>} : vector<4x2xf32>, vector<2x256xf32>, vector<4x256xf32> -> vector<4x256xf32>
    %15 = arith.addf %4, %14 : vector<4x256xf32>
    %c0_16 = arith.constant 0 : index
    %c0_17 = arith.constant 0 : index
    %16 = vector.load %arg8[%c0_16, %c0_17] : memref<4x1xf32, #tpu.memory_space<vmem>>, vector<4x1xf32>
    %17 = vector.broadcast %16 : vector<4x1xf32> to vector<4x256xf32>
    %18 = arith.mulf %15, %17 : vector<4x256xf32>
    %c0_18 = arith.constant 0 : index
    %c0_19 = arith.constant 0 : index
    %19 = vector.load %arg9[%c0_18, %c0_19] : memref<4x1xf32, #tpu.memory_space<vmem>>, vector<4x1xf32>
    %20 = vector.broadcast %19 : vector<4x1xf32> to vector<4x256xf32>
    %21 = arith.addf %18, %20 : vector<4x256xf32>
    %cst_20 = arith.constant 0.000000e+00 : f32
    %22 = vector.broadcast %cst_20 : f32 to vector<4x256xf32>
    %23 = arith.maximumf %21, %22 : vector<4x256xf32>
    %c0_21 = arith.constant 0 : index
    %c0_22 = arith.constant 0 : index
    %24 = vector.load %arg10[%c0_21, %c0_22] : memref<4x256xf32, #tpu.memory_space<vmem>>, vector<4x256xf32>
    tpu.vector_store %arg10[%c0_21, %c0_22], %23 {strides = array<i32>} : memref<4x256xf32, #tpu.memory_space<vmem>>, vector<4x256xf32>,
    return
  }
  func.func @transform_0(%arg0: i32) -> (i32, i32) {
    %c0_i32 = arith.constant 0 : i32
    %c0_i32_0 = arith.constant 0 : i32
    %c0_i32_1 = arith.constant 0 : i32
    return %c0_i32, %c0_i32_0 : i32, i32
  }
  func.func @transform_1(%arg0: i32) -> (i32, i32) {
    %c0_i32 = arith.constant 0 : i32
    %c0_i32_0 = arith.constant 0 : i32
    return %c0_i32, %arg0 : i32, i32
  }
  func.func @transform_2(%arg0: i32) -> (i32, i32) {
    %c0_i32 = arith.constant 0 : i32
    %c0_i32_0 = arith.constant 0 : i32
    return %c0_i32, %arg0 : i32, i32
  }
  func.func @transform_3(%arg0: i32) -> (i32, i32) {
    %c0_i32 = arith.constant 0 : i32
    %c0_i32_0 = arith.constant 0 : i32
    %c0_i32_1 = arith.constant 0 : i32
    return %c0_i32, %c0_i32_0 : i32, i32
  }
  func.func @transform_4(%arg0: i32) -> (i32, i32) {
    %c0_i32 = arith.constant 0 : i32
    %c0_i32_0 = arith.constant 0 : i32
    %c0_i32_1 = arith.constant 0 : i32
    return %c0_i32, %c0_i32_0 : i32, i32
  }
  func.func @transform_5(%arg0: i32) -> (i32, i32) {
    %c0_i32 = arith.constant 0 : i32
    %c0_i32_0 = arith.constant 0 : i32
    %c0_i32_1 = arith.constant 0 : i32
    return %c0_i32, %c0_i32_0 : i32, i32
  }
  func.func @transform_6(%arg0: i32) -> (i32, i32) {
    %c0_i32 = arith.constant 0 : i32
    %c0_i32_0 = arith.constant 0 : i32
    return %c0_i32, %arg0 : i32, i32
  }
  func.func @transform_7(%arg0: i32) -> (i32, i32) {
    %c0_i32 = arith.constant 0 : i32
    %c0_i32_0 = arith.constant 0 : i32
    %c0_i32_1 = arith.constant 0 : i32
    return %c0_i32, %c0_i32_0 : i32, i32
  }
  func.func @transform_8(%arg0: i32) -> (i32, i32) {
    %c0_i32 = arith.constant 0 : i32
    %c0_i32_0 = arith.constant 0 : i32
    %c0_i32_1 = arith.constant 0 : i32
    return %c0_i32, %c0_i32_0 : i32, i32
  }
  func.func @transform_9(%arg0: i32) -> (i32, i32) {
    %c0_i32 = arith.constant 0 : i32
    %c0_i32_0 = arith.constant 0 : i32
    return %c0_i32, %arg0 : i32, i32
  }
}

module attributes {stable_mosaic.version = 11 : i64} {
  func.func @_conv_bn_relu_kernel(%arg0: i32, %arg1: memref<8x36xf32, #tpu.memory_space<vmem>>, %arg2: memref<36x128xf32, #tpu.memory_space<vmem>>, %arg3: memref<8x1xf32, #tpu.memory_space<vmem>>, %arg4: memref<8x1xf32, #tpu.memory_space<vmem>>, %arg5: memref<8x128xf32, #tpu.memory_space<vmem>>) attributes {dimension_semantics = [#tpu.dimension_semantics<parallel>], iteration_bounds = array<i64: 1>, scalar_prefetch = 0 : i64, scratch_operands = 0 : i64, tpu.core_type = #tpu.core_type<tc>, window_params = [{pipeline_mode = #tpu.pipeline_mode<synchronous>, transform_indices = @transform_0, window_bounds = array<i64: 8, 36>}, {transform_indices = @transform_1, window_bounds = array<i64: 36, 128>}, {pipeline_mode = #tpu.pipeline_mode<synchronous>, transform_indices = @transform_2, window_bounds = array<i64: 8, 1>}, {pipeline_mode = #tpu.pipeline_mode<synchronous>, transform_indices = @transform_3, window_bounds = array<i64: 8, 1>}, {transform_indices = @transform_4, window_bounds = array<i64: 8, 128>}]} {
    %c0 = arith.constant 0 : index
    %c0_0 = arith.constant 0 : index
    %0 = vector.load %arg1[%c0, %c0_0] : memref<8x36xf32, #tpu.memory_space<vmem>>, vector<8x36xf32>
    %c0_1 = arith.constant 0 : index
    %c0_2 = arith.constant 0 : index
    %1 = vector.load %arg2[%c0_1, %c0_2] : memref<36x128xf32, #tpu.memory_space<vmem>>, vector<36x128xf32>
    %cst = arith.constant dense<0.000000e+00> : vector<8x128xf32>
    %2 = tpu.matmul %0, %1, %cst {dimension_numbers = #tpu.dot_dimension_numbers<[1], [0], [0], [1], [0, 0, 1, 1], [], []>} : vector<8x36xf32>, vector<36x128xf32>, vector<8x128xf32> -> vector<8x128xf32>
    %c0_3 = arith.constant 0 : index
    %c0_4 = arith.constant 0 : index
    %3 = vector.load %arg3[%c0_3, %c0_4] : memref<8x1xf32, #tpu.memory_space<vmem>>, vector<8x1xf32>
    %4 = vector.broadcast %3 : vector<8x1xf32> to vector<8x128xf32>
    %5 = arith.mulf %2, %4 : vector<8x128xf32>
    %c0_5 = arith.constant 0 : index
    %c0_6 = arith.constant 0 : index
    %6 = vector.load %arg4[%c0_5, %c0_6] : memref<8x1xf32, #tpu.memory_space<vmem>>, vector<8x1xf32>
    %7 = vector.broadcast %6 : vector<8x1xf32> to vector<8x128xf32>
    %8 = arith.addf %5, %7 : vector<8x128xf32>
    %cst_7 = arith.constant 0.000000e+00 : f32
    %9 = vector.broadcast %cst_7 : f32 to vector<8x128xf32>
    %10 = arith.maximumf %8, %9 : vector<8x128xf32>
    %c0_8 = arith.constant 0 : index
    %c0_9 = arith.constant 0 : index
    %11 = vector.load %arg5[%c0_8, %c0_9] : memref<8x128xf32, #tpu.memory_space<vmem>>, vector<8x128xf32>
    tpu.vector_store %arg5[%c0_8, %c0_9], %10 {strides = array<i32>} : memref<8x128xf32, #tpu.memory_space<vmem>>, vector<8x128xf32>,
    return
  }
  func.func @transform_0(%arg0: i32) -> (i32, i32) {
    %c0_i32 = arith.constant 0 : i32
    %c0_i32_0 = arith.constant 0 : i32
    %c0_i32_1 = arith.constant 0 : i32
    return %c0_i32, %c0_i32_0 : i32, i32
  }
  func.func @transform_1(%arg0: i32) -> (i32, i32) {
    %c0_i32 = arith.constant 0 : i32
    %c0_i32_0 = arith.constant 0 : i32
    return %c0_i32, %arg0 : i32, i32
  }
  func.func @transform_2(%arg0: i32) -> (i32, i32) {
    %c0_i32 = arith.constant 0 : i32
    %c0_i32_0 = arith.constant 0 : i32
    %c0_i32_1 = arith.constant 0 : i32
    return %c0_i32, %c0_i32_0 : i32, i32
  }
  func.func @transform_3(%arg0: i32) -> (i32, i32) {
    %c0_i32 = arith.constant 0 : i32
    %c0_i32_0 = arith.constant 0 : i32
    %c0_i32_1 = arith.constant 0 : i32
    return %c0_i32, %c0_i32_0 : i32, i32
  }
  func.func @transform_4(%arg0: i32) -> (i32, i32) {
    %c0_i32 = arith.constant 0 : i32
    %c0_i32_0 = arith.constant 0 : i32
    return %c0_i32, %arg0 : i32, i32
  }
}

module attributes {stable_mosaic.version = 11 : i64} {
  func.func @_conv_shortcut_bn_relu_kernel(%arg0: i32, %arg1: memref<8x72xf32, #tpu.memory_space<vmem>>, %arg2: memref<72x128xf32, #tpu.memory_space<vmem>>, %arg3: memref<8x4xf32, #tpu.memory_space<vmem>>, %arg4: memref<4x128xf32, #tpu.memory_space<vmem>>, %arg5: memref<8x1xf32, #tpu.memory_space<vmem>>, %arg6: memref<8x1xf32, #tpu.memory_space<vmem>>, %arg7: memref<8x128xf32, #tpu.memory_space<vmem>>) attributes {dimension_semantics = [#tpu.dimension_semantics<parallel>], iteration_bounds = array<i64: 1>, scalar_prefetch = 0 : i64, scratch_operands = 0 : i64, tpu.core_type = #tpu.core_type<tc>, window_params = [{pipeline_mode = #tpu.pipeline_mode<synchronous>, transform_indices = @transform_0, window_bounds = array<i64: 8, 72>}, {transform_indices = @transform_1, window_bounds = array<i64: 72, 128>}, {pipeline_mode = #tpu.pipeline_mode<synchronous>, transform_indices = @transform_2, window_bounds = array<i64: 8, 4>}, {transform_indices = @transform_3, window_bounds = array<i64: 4, 128>}, {pipeline_mode = #tpu.pipeline_mode<synchronous>, transform_indices = @transform_4, window_bounds = array<i64: 8, 1>}, {pipeline_mode = #tpu.pipeline_mode<synchronous>, transform_indices = @transform_5, window_bounds = array<i64: 8, 1>}, {transform_indices = @transform_6, window_bounds = array<i64: 8, 128>}]} {
    %c0 = arith.constant 0 : index
    %c0_0 = arith.constant 0 : index
    %0 = vector.load %arg1[%c0, %c0_0] : memref<8x72xf32, #tpu.memory_space<vmem>>, vector<8x72xf32>
    %c0_1 = arith.constant 0 : index
    %c0_2 = arith.constant 0 : index
    %1 = vector.load %arg2[%c0_1, %c0_2] : memref<72x128xf32, #tpu.memory_space<vmem>>, vector<72x128xf32>
    %cst = arith.constant dense<0.000000e+00> : vector<8x128xf32>
    %2 = tpu.matmul %0, %1, %cst {dimension_numbers = #tpu.dot_dimension_numbers<[1], [0], [0], [1], [0, 0, 1, 1], [], []>} : vector<8x72xf32>, vector<72x128xf32>, vector<8x128xf32> -> vector<8x128xf32>
    %c0_3 = arith.constant 0 : index
    %c0_4 = arith.constant 0 : index
    %3 = vector.load %arg3[%c0_3, %c0_4] : memref<8x4xf32, #tpu.memory_space<vmem>>, vector<8x4xf32>
    %c0_5 = arith.constant 0 : index
    %c0_6 = arith.constant 0 : index
    %4 = vector.load %arg4[%c0_5, %c0_6] : memref<4x128xf32, #tpu.memory_space<vmem>>, vector<4x128xf32>
    %cst_7 = arith.constant dense<0.000000e+00> : vector<8x128xf32>
    %5 = tpu.matmul %3, %4, %cst_7 {dimension_numbers = #tpu.dot_dimension_numbers<[1], [0], [0], [1], [0, 0, 1, 1], [], []>} : vector<8x4xf32>, vector<4x128xf32>, vector<8x128xf32> -> vector<8x128xf32>
    %6 = arith.addf %2, %5 : vector<8x128xf32>
    %c0_8 = arith.constant 0 : index
    %c0_9 = arith.constant 0 : index
    %7 = vector.load %arg5[%c0_8, %c0_9] : memref<8x1xf32, #tpu.memory_space<vmem>>, vector<8x1xf32>
    %8 = vector.broadcast %7 : vector<8x1xf32> to vector<8x128xf32>
    %9 = arith.mulf %6, %8 : vector<8x128xf32>
    %c0_10 = arith.constant 0 : index
    %c0_11 = arith.constant 0 : index
    %10 = vector.load %arg6[%c0_10, %c0_11] : memref<8x1xf32, #tpu.memory_space<vmem>>, vector<8x1xf32>
    %11 = vector.broadcast %10 : vector<8x1xf32> to vector<8x128xf32>
    %12 = arith.addf %9, %11 : vector<8x128xf32>
    %cst_12 = arith.constant 0.000000e+00 : f32
    %13 = vector.broadcast %cst_12 : f32 to vector<8x128xf32>
    %14 = arith.maximumf %12, %13 : vector<8x128xf32>
    %c0_13 = arith.constant 0 : index
    %c0_14 = arith.constant 0 : index
    %15 = vector.load %arg7[%c0_13, %c0_14] : memref<8x128xf32, #tpu.memory_space<vmem>>, vector<8x128xf32>
    tpu.vector_store %arg7[%c0_13, %c0_14], %14 {strides = array<i32>} : memref<8x128xf32, #tpu.memory_space<vmem>>, vector<8x128xf32>,
    return
  }
  func.func @transform_0(%arg0: i32) -> (i32, i32) {
    %c0_i32 = arith.constant 0 : i32
    %c0_i32_0 = arith.constant 0 : i32
    %c0_i32_1 = arith.constant 0 : i32
    return %c0_i32, %c0_i32_0 : i32, i32
  }
  func.func @transform_1(%arg0: i32) -> (i32, i32) {
    %c0_i32 = arith.constant 0 : i32
    %c0_i32_0 = arith.constant 0 : i32
    return %c0_i32, %arg0 : i32, i32
  }
  func.func @transform_2(%arg0: i32) -> (i32, i32) {
    %c0_i32 = arith.constant 0 : i32
    %c0_i32_0 = arith.constant 0 : i32
    %c0_i32_1 = arith.constant 0 : i32
    return %c0_i32, %c0_i32_0 : i32, i32
  }
  func.func @transform_3(%arg0: i32) -> (i32, i32) {
    %c0_i32 = arith.constant 0 : i32
    %c0_i32_0 = arith.constant 0 : i32
    return %c0_i32, %arg0 : i32, i32
  }
  func.func @transform_4(%arg0: i32) -> (i32, i32) {
    %c0_i32 = arith.constant 0 : i32
    %c0_i32_0 = arith.constant 0 : i32
    %c0_i32_1 = arith.constant 0 : i32
    return %c0_i32, %c0_i32_0 : i32, i32
  }
  func.func @transform_5(%arg0: i32) -> (i32, i32) {
    %c0_i32 = arith.constant 0 : i32
    %c0_i32_0 = arith.constant 0 : i32
    %c0_i32_1 = arith.constant 0 : i32
    return %c0_i32, %c0_i32_0 : i32, i32
  }
  func.func @transform_6(%arg0: i32) -> (i32, i32) {
    %c0_i32 = arith.constant 0 : i32
    %c0_i32_0 = arith.constant 0 : i32
    return %c0_i32, %arg0 : i32, i32
  }
}

module attributes {stable_mosaic.version = 11 : i64} {
  func.func @_conv_bn_relu_kernel(%arg0: i32, %arg1: memref<16x72xf32, #tpu.memory_space<vmem>>, %arg2: memref<72x32xf32, #tpu.memory_space<vmem>>, %arg3: memref<16x1xf32, #tpu.memory_space<vmem>>, %arg4: memref<16x1xf32, #tpu.memory_space<vmem>>, %arg5: memref<16x32xf32, #tpu.memory_space<vmem>>) attributes {dimension_semantics = [#tpu.dimension_semantics<parallel>], iteration_bounds = array<i64: 1>, scalar_prefetch = 0 : i64, scratch_operands = 0 : i64, tpu.core_type = #tpu.core_type<tc>, window_params = [{pipeline_mode = #tpu.pipeline_mode<synchronous>, transform_indices = @transform_0, window_bounds = array<i64: 16, 72>}, {transform_indices = @transform_1, window_bounds = array<i64: 72, 32>}, {pipeline_mode = #tpu.pipeline_mode<synchronous>, transform_indices = @transform_2, window_bounds = array<i64: 16, 1>}, {pipeline_mode = #tpu.pipeline_mode<synchronous>, transform_indices = @transform_3, window_bounds = array<i64: 16, 1>}, {transform_indices = @transform_4, window_bounds = array<i64: 16, 32>}]} {
    %c0 = arith.constant 0 : index
    %c0_0 = arith.constant 0 : index
    %0 = vector.load %arg1[%c0, %c0_0] : memref<16x72xf32, #tpu.memory_space<vmem>>, vector<16x72xf32>
    %c0_1 = arith.constant 0 : index
    %c0_2 = arith.constant 0 : index
    %1 = vector.load %arg2[%c0_1, %c0_2] : memref<72x32xf32, #tpu.memory_space<vmem>>, vector<72x32xf32>
    %cst = arith.constant dense<0.000000e+00> : vector<16x32xf32>
    %2 = tpu.matmul %0, %1, %cst {dimension_numbers = #tpu.dot_dimension_numbers<[1], [0], [0], [1], [0, 0, 1, 1], [], []>} : vector<16x72xf32>, vector<72x32xf32>, vector<16x32xf32> -> vector<16x32xf32>
    %c0_3 = arith.constant 0 : index
    %c0_4 = arith.constant 0 : index
    %3 = vector.load %arg3[%c0_3, %c0_4] : memref<16x1xf32, #tpu.memory_space<vmem>>, vector<16x1xf32>
    %4 = vector.broadcast %3 : vector<16x1xf32> to vector<16x32xf32>
    %5 = arith.mulf %2, %4 : vector<16x32xf32>
    %c0_5 = arith.constant 0 : index
    %c0_6 = arith.constant 0 : index
    %6 = vector.load %arg4[%c0_5, %c0_6] : memref<16x1xf32, #tpu.memory_space<vmem>>, vector<16x1xf32>
    %7 = vector.broadcast %6 : vector<16x1xf32> to vector<16x32xf32>
    %8 = arith.addf %5, %7 : vector<16x32xf32>
    %cst_7 = arith.constant 0.000000e+00 : f32
    %9 = vector.broadcast %cst_7 : f32 to vector<16x32xf32>
    %10 = arith.maximumf %8, %9 : vector<16x32xf32>
    %c0_8 = arith.constant 0 : index
    %c0_9 = arith.constant 0 : index
    %11 = vector.load %arg5[%c0_8, %c0_9] : memref<16x32xf32, #tpu.memory_space<vmem>>, vector<16x32xf32>
    tpu.vector_store %arg5[%c0_8, %c0_9], %10 {strides = array<i32>} : memref<16x32xf32, #tpu.memory_space<vmem>>, vector<16x32xf32>,
    return
  }
  func.func @transform_0(%arg0: i32) -> (i32, i32) {
    %c0_i32 = arith.constant 0 : i32
    %c0_i32_0 = arith.constant 0 : i32
    %c0_i32_1 = arith.constant 0 : i32
    return %c0_i32, %c0_i32_0 : i32, i32
  }
  func.func @transform_1(%arg0: i32) -> (i32, i32) {
    %c0_i32 = arith.constant 0 : i32
    %c0_i32_0 = arith.constant 0 : i32
    return %c0_i32, %arg0 : i32, i32
  }
  func.func @transform_2(%arg0: i32) -> (i32, i32) {
    %c0_i32 = arith.constant 0 : i32
    %c0_i32_0 = arith.constant 0 : i32
    %c0_i32_1 = arith.constant 0 : i32
    return %c0_i32, %c0_i32_0 : i32, i32
  }
  func.func @transform_3(%arg0: i32) -> (i32, i32) {
    %c0_i32 = arith.constant 0 : i32
    %c0_i32_0 = arith.constant 0 : i32
    %c0_i32_1 = arith.constant 0 : i32
    return %c0_i32, %c0_i32_0 : i32, i32
  }
  func.func @transform_4(%arg0: i32) -> (i32, i32) {
    %c0_i32 = arith.constant 0 : i32
    %c0_i32_0 = arith.constant 0 : i32
    return %c0_i32, %arg0 : i32, i32
  }
}

module attributes {stable_mosaic.version = 11 : i64} {
  func.func @_conv_shortcut_bn_relu_kernel(%arg0: i32, %arg1: memref<16x144xf32, #tpu.memory_space<vmem>>, %arg2: memref<144x32xf32, #tpu.memory_space<vmem>>, %arg3: memref<16x8xf32, #tpu.memory_space<vmem>>, %arg4: memref<8x32xf32, #tpu.memory_space<vmem>>, %arg5: memref<16x1xf32, #tpu.memory_space<vmem>>, %arg6: memref<16x1xf32, #tpu.memory_space<vmem>>, %arg7: memref<16x32xf32, #tpu.memory_space<vmem>>) attributes {dimension_semantics = [#tpu.dimension_semantics<parallel>], iteration_bounds = array<i64: 1>, scalar_prefetch = 0 : i64, scratch_operands = 0 : i64, tpu.core_type = #tpu.core_type<tc>, window_params = [{pipeline_mode = #tpu.pipeline_mode<synchronous>, transform_indices = @transform_0, window_bounds = array<i64: 16, 144>}, {transform_indices = @transform_1, window_bounds = array<i64: 144, 32>}, {pipeline_mode = #tpu.pipeline_mode<synchronous>, transform_indices = @transform_2, window_bounds = array<i64: 16, 8>}, {transform_indices = @transform_3, window_bounds = array<i64: 8, 32>}, {pipeline_mode = #tpu.pipeline_mode<synchronous>, transform_indices = @transform_4, window_bounds = array<i64: 16, 1>}, {pipeline_mode = #tpu.pipeline_mode<synchronous>, transform_indices = @transform_5, window_bounds = array<i64: 16, 1>}, {transform_indices = @transform_6, window_bounds = array<i64: 16, 32>}]} {
    %c0 = arith.constant 0 : index
    %c0_0 = arith.constant 0 : index
    %0 = vector.load %arg1[%c0, %c0_0] : memref<16x144xf32, #tpu.memory_space<vmem>>, vector<16x144xf32>
    %c0_1 = arith.constant 0 : index
    %c0_2 = arith.constant 0 : index
    %1 = vector.load %arg2[%c0_1, %c0_2] : memref<144x32xf32, #tpu.memory_space<vmem>>, vector<144x32xf32>
    %cst = arith.constant dense<0.000000e+00> : vector<16x32xf32>
    %2 = tpu.matmul %0, %1, %cst {dimension_numbers = #tpu.dot_dimension_numbers<[1], [0], [0], [1], [0, 0, 1, 1], [], []>} : vector<16x144xf32>, vector<144x32xf32>, vector<16x32xf32> -> vector<16x32xf32>
    %c0_3 = arith.constant 0 : index
    %c0_4 = arith.constant 0 : index
    %3 = vector.load %arg3[%c0_3, %c0_4] : memref<16x8xf32, #tpu.memory_space<vmem>>, vector<16x8xf32>
    %c0_5 = arith.constant 0 : index
    %c0_6 = arith.constant 0 : index
    %4 = vector.load %arg4[%c0_5, %c0_6] : memref<8x32xf32, #tpu.memory_space<vmem>>, vector<8x32xf32>
    %cst_7 = arith.constant dense<0.000000e+00> : vector<16x32xf32>
    %5 = tpu.matmul %3, %4, %cst_7 {dimension_numbers = #tpu.dot_dimension_numbers<[1], [0], [0], [1], [0, 0, 1, 1], [], []>} : vector<16x8xf32>, vector<8x32xf32>, vector<16x32xf32> -> vector<16x32xf32>
    %6 = arith.addf %2, %5 : vector<16x32xf32>
    %c0_8 = arith.constant 0 : index
    %c0_9 = arith.constant 0 : index
    %7 = vector.load %arg5[%c0_8, %c0_9] : memref<16x1xf32, #tpu.memory_space<vmem>>, vector<16x1xf32>
    %8 = vector.broadcast %7 : vector<16x1xf32> to vector<16x32xf32>
    %9 = arith.mulf %6, %8 : vector<16x32xf32>
    %c0_10 = arith.constant 0 : index
    %c0_11 = arith.constant 0 : index
    %10 = vector.load %arg6[%c0_10, %c0_11] : memref<16x1xf32, #tpu.memory_space<vmem>>, vector<16x1xf32>
    %11 = vector.broadcast %10 : vector<16x1xf32> to vector<16x32xf32>
    %12 = arith.addf %9, %11 : vector<16x32xf32>
    %cst_12 = arith.constant 0.000000e+00 : f32
    %13 = vector.broadcast %cst_12 : f32 to vector<16x32xf32>
    %14 = arith.maximumf %12, %13 : vector<16x32xf32>
    %c0_13 = arith.constant 0 : index
    %c0_14 = arith.constant 0 : index
    %15 = vector.load %arg7[%c0_13, %c0_14] : memref<16x32xf32, #tpu.memory_space<vmem>>, vector<16x32xf32>
    tpu.vector_store %arg7[%c0_13, %c0_14], %14 {strides = array<i32>} : memref<16x32xf32, #tpu.memory_space<vmem>>, vector<16x32xf32>,
    return
  }
  func.func @transform_0(%arg0: i32) -> (i32, i32) {
    %c0_i32 = arith.constant 0 : i32
    %c0_i32_0 = arith.constant 0 : i32
    %c0_i32_1 = arith.constant 0 : i32
    return %c0_i32, %c0_i32_0 : i32, i32
  }
  func.func @transform_1(%arg0: i32) -> (i32, i32) {
    %c0_i32 = arith.constant 0 : i32
    %c0_i32_0 = arith.constant 0 : i32
    return %c0_i32, %arg0 : i32, i32
  }
  func.func @transform_2(%arg0: i32) -> (i32, i32) {
    %c0_i32 = arith.constant 0 : i32
    %c0_i32_0 = arith.constant 0 : i32
    %c0_i32_1 = arith.constant 0 : i32
    return %c0_i32, %c0_i32_0 : i32, i32
  }
  func.func @transform_3(%arg0: i32) -> (i32, i32) {
    %c0_i32 = arith.constant 0 : i32
    %c0_i32_0 = arith.constant 0 : i32
    return %c0_i32, %arg0 : i32, i32
  }
  func.func @transform_4(%arg0: i32) -> (i32, i32) {
    %c0_i32 = arith.constant 0 : i32
    %c0_i32_0 = arith.constant 0 : i32
    %c0_i32_1 = arith.constant 0 : i32
    return %c0_i32, %c0_i32_0 : i32, i32
  }
  func.func @transform_5(%arg0: i32) -> (i32, i32) {
    %c0_i32 = arith.constant 0 : i32
    %c0_i32_0 = arith.constant 0 : i32
    %c0_i32_1 = arith.constant 0 : i32
    return %c0_i32, %c0_i32_0 : i32, i32
  }
  func.func @transform_6(%arg0: i32) -> (i32, i32) {
    %c0_i32 = arith.constant 0 : i32
    %c0_i32_0 = arith.constant 0 : i32
    return %c0_i32, %arg0 : i32, i32
  }
}

module attributes {stable_mosaic.version = 11 : i64} {
  func.func @_pool_fc_kernel(%arg0: i32, %arg1: memref<16x32xf32, #tpu.memory_space<vmem>>, %arg2: memref<32x2xf32, #tpu.memory_space<vmem>>, %arg3: memref<10x16xf32, #tpu.memory_space<vmem>>, %arg4: memref<10x1xf32, #tpu.memory_space<vmem>>, %arg5: memref<10x2xf32, #tpu.memory_space<vmem>>) attributes {dimension_semantics = [#tpu.dimension_semantics<arbitrary>], iteration_bounds = array<i64: 1>, scalar_prefetch = 0 : i64, scratch_operands = 0 : i64, tpu.core_type = #tpu.core_type<tc>, window_params = [{pipeline_mode = #tpu.pipeline_mode<synchronous>, transform_indices = @transform_0, window_bounds = array<i64: 16, 32>}, {pipeline_mode = #tpu.pipeline_mode<synchronous>, transform_indices = @transform_1, window_bounds = array<i64: 32, 2>}, {pipeline_mode = #tpu.pipeline_mode<synchronous>, transform_indices = @transform_2, window_bounds = array<i64: 10, 16>}, {pipeline_mode = #tpu.pipeline_mode<synchronous>, transform_indices = @transform_3, window_bounds = array<i64: 10, 1>}, {pipeline_mode = #tpu.pipeline_mode<synchronous>, transform_indices = @transform_4, window_bounds = array<i64: 10, 2>}]} {
    %c0 = arith.constant 0 : index
    %c0_0 = arith.constant 0 : index
    %0 = vector.load %arg1[%c0, %c0_0] : memref<16x32xf32, #tpu.memory_space<vmem>>, vector<16x32xf32>
    %c0_1 = arith.constant 0 : index
    %c0_2 = arith.constant 0 : index
    %1 = vector.load %arg2[%c0_1, %c0_2] : memref<32x2xf32, #tpu.memory_space<vmem>>, vector<32x2xf32>
    %cst = arith.constant dense<0.000000e+00> : vector<16x2xf32>
    %2 = tpu.matmul %0, %1, %cst {dimension_numbers = #tpu.dot_dimension_numbers<[1], [0], [0], [1], [0, 0, 1, 1], [], []>} : vector<16x32xf32>, vector<32x2xf32>, vector<16x2xf32> -> vector<16x2xf32>
    %c0_3 = arith.constant 0 : index
    %c0_4 = arith.constant 0 : index
    %3 = vector.load %arg3[%c0_3, %c0_4] : memref<10x16xf32, #tpu.memory_space<vmem>>, vector<10x16xf32>
    %cst_5 = arith.constant dense<0.000000e+00> : vector<10x2xf32>
    %4 = tpu.matmul %3, %2, %cst_5 {dimension_numbers = #tpu.dot_dimension_numbers<[1], [0], [0], [1], [0, 0, 1, 1], [], []>} : vector<10x16xf32>, vector<16x2xf32>, vector<10x2xf32> -> vector<10x2xf32>
    %c0_6 = arith.constant 0 : index
    %c0_7 = arith.constant 0 : index
    %5 = vector.load %arg4[%c0_6, %c0_7] : memref<10x1xf32, #tpu.memory_space<vmem>>, vector<10x1xf32>
    %6 = vector.broadcast %5 : vector<10x1xf32> to vector<10x2xf32>
    %7 = arith.addf %4, %6 : vector<10x2xf32>
    %c0_8 = arith.constant 0 : index
    %c0_9 = arith.constant 0 : index
    %8 = vector.load %arg5[%c0_8, %c0_9] : memref<10x2xf32, #tpu.memory_space<vmem>>, vector<10x2xf32>
    tpu.vector_store %arg5[%c0_8, %c0_9], %7 {strides = array<i32>} : memref<10x2xf32, #tpu.memory_space<vmem>>, vector<10x2xf32>,
    return
  }
  func.func @transform_0(%arg0: i32) -> (i32, i32) {
    %c0_i32 = arith.constant 0 : i32
    %c0_i32_0 = arith.constant 0 : i32
    %c0_i32_1 = arith.constant 0 : i32
    return %c0_i32, %c0_i32_0 : i32, i32
  }
  func.func @transform_1(%arg0: i32) -> (i32, i32) {
    %c0_i32 = arith.constant 0 : i32
    %c0_i32_0 = arith.constant 0 : i32
    %c0_i32_1 = arith.constant 0 : i32
    return %c0_i32, %c0_i32_0 : i32, i32
  }
  func.func @transform_2(%arg0: i32) -> (i32, i32) {
    %c0_i32 = arith.constant 0 : i32
    %c0_i32_0 = arith.constant 0 : i32
    %c0_i32_1 = arith.constant 0 : i32
    return %c0_i32, %c0_i32_0 : i32, i32
  }
  func.func @transform_3(%arg0: i32) -> (i32, i32) {
    %c0_i32 = arith.constant 0 : i32
    %c0_i32_0 = arith.constant 0 : i32
    %c0_i32_1 = arith.constant 0 : i32
    return %c0_i32, %c0_i32_0 : i32, i32
  }
  func.func @transform_4(%arg0: i32) -> (i32, i32) {
    %c0_i32 = arith.constant 0 : i32
    %c0_i32_0 = arith.constant 0 : i32
    %c0_i32_1 = arith.constant 0 : i32
    return %c0_i32, %c0_i32_0 : i32, i32
  }
}

</mosaic_0001>

<bundles_post_ra>
// kernel: forward.8
= control target key start
LH: loop header
LB: loop body
LE: loop exit
PB: predicated region body
PF: predicated region fallthrough
CT: control target
= control target key end

     0   :  { %11 = vsyncpa [#allocation3], 0  ;;  %s675_s18 = smov 0   ;;  %s677_s19 = smov 0   ;;  %s782_s0 = inlined_call_operand.hbm [shape: f32[4,27], index: 0, kind: input, shape index: {}]   ;;  %s783_s1 = inlined_call_operand.vmem [shape: f32[27,512], index: 1, kind: input, shape index: {}]   ;;  %s784_s2 = inlined_call_operand.vmem [shape: f32[4,1], index: 2, kind: input, shape index: {}]   ;;  %s785_s3 = inlined_call_operand.vmem [shape: f32[4,1], index: 3, kind: input, shape index: {}]   ;;  %s786_s4 = inlined_call_operand.vmem [shape: f32[4,512], index: 4, kind: output, shape index: {0}]   ;;  %s787_s5 = inlined_call_operand.vmem [shape: f32[4,512], index: 5, kind: output, shape index: {1}]  }
   0x1   :  { %s679_s20 = smov 0  }
   0x2 LB: > { %s515_s21 = sadd.s32 4294967295, %s639_s20   ;;  %s692_s22 = sadd.s32 1, %s639_s20   ;;  %s639_s20 = sphi %s679_s20, %s800_s20   ;;  %s635_s19 = sphi %s677_s19, %s799_s19   ;;  %s631_s18 = sphi %s675_s18, %s798_s18  }
   0x3   : > { %s42_s23 = ssub.s32 %s639_s20, %s692_s22  ;;  %s45_s24 = sadd.s32 1, %s635_s19 }
   0x4   : > { %p43_p0 = scmp.eq.s32.totalorder %s42_s23, 0  ;;  %p52_p1 = scmp.ne.s32.totalorder %s635_s19, %s631_s18 }
   0x5   : > { %p53_p2 = scmp.eq.s32.totalorder %s639_s20, 0  ;;  %p517_p3 = scmp.ge.s32.totalorder %s639_s20, 1 }
   0x6   : > { %s702_s25 = scalar_select %p43_p0, %s635_s19, %s45_s24  }
   0x7   : > { %p704_p4 = por %p53_p2, %p52_p1  ;;  %p163_p5 = scmp.lt.s32.totalorder %s639_s20, 3 }
   0x8   : > { %p711_p6 = scmp.eq.s32.totalorder %s515_s21, 0  ;;  %s641_s29 = smov [#allocation2]  }
   0x9   : > { %s791_s26 = scalar_select %p704_p4, 1, 0 }
   0xa   : > { %s792_s27 = scalar_select %p711_p6, 1, 0 }
   0xb   : > { %p715_p7 = pnand %p517_p3, %p163_p5  ;;  %s176_s30 = sshll.u32 %s641_s29, 4  ;;  %s177_s30 = int_to_ptr.vmem [resolvable:$true] %s176_s30 }
   0xc   : > { %s585_s9 = scalar_lea.hbm %s782_s0, 64 }
   0xd   : > { %s793_s28 = scalar_select %p715_p7, 1, 0 }
   0xe   : > { %p550_p8 = pneg %p715_p7  ;;  %p586_p10 = scmp.ne.s32.totalorder %s782_s0, %s585_s9 }
   0xf   : > { %p592_p0 = scmp.lt.u32.totalorder %s585_s9, %s782_s0 }
  0x10   : > { %p723_p9 = pnand %p711_p6, %p550_p8 }
  0x12   : > { %p587_p11 = pneg %p723_p9 }
  0x14   : > { %p588_p12 = pnand %p587_p11, %p586_p10 }
  0x16   : > { %p589_p13 = pneg %p588_p12 }
  0x18   : > { %p594_p1 = pnand %p592_p0, %p589_p13 }
  0x1a   : > { %597 = shalt.err (!%p594_p1)
}
  0x1b   : > { %s598_s14 = scalar_lea.vmem %s177_s30, 64  ;;  %p606_p8 = scmp.lt.s32.totalorder %s177_s30, %s177_s30 }
  0x1c   : > { %p599_p2 = scmp.ne.s32.totalorder %s177_s30, %s598_s14  ;;  %p607_p6 = scmp.lt.s32.totalorder %s598_s14, %s598_s14 }
  0x1e   : > { %p601_p3 = pnand %p599_p2, %p587_p11  ;;  %p608_p7 = por %p607_p6, %p606_p8 }
  0x20   : > { %p602_p5 = pneg %p601_p3 }
  0x22   : > { %p609_p4 = pnand %p608_p7, %p602_p5 }
  0x24   : > { %612 = shalt.err (!%p609_p4)
}
  0x25   : > { %553 = dma.hbm_to_vmem [thread:$0]  (!%p723_p9), %s782_s0, 64, %s177_s30, [#allocation3]  }
  0x26   : > { %p519_p10 = scmp.ge.s32.totalorder %s639_s20, 2 }
  0x27   : > { %p795_p12 = scmp.ne.s32.totalorder (!%p519_p10), %s791_s26, 0 }
  0x28   : > { %189 = sbr.rel (%p519_p10) target bundleno = 55 (0x37), region = 28 }
  0x2f   : > { %192 = sbr.rel (!%p795_p12) target bundleno = 55 (0x37), region = 32  ;;  %s194_s17 = sand.u32 (%p795_p12), 1, %s635_s19  }
  0x30   : > { %s535_s23 = sshll.u32 (%p795_p12), %s639_s20, 4  ;;  %s520_s24 = sshll.u32 (%p795_p12), %s194_s17, 6 }
  0x31   : > { %s199_s8 = scalar_lea.vmem (%p795_p12), %s783_s1, %s535_s23  ;;  %s196_s6 = scalar_lea.vmem (%p795_p12), [#allocation4], %s520_s24 }
  0x32   : > { %v212_v0 = vld [vmem:[%s199_s8] sm:$0xff] (%p795_p12)  ;;  %v214_v1 = vld [vmem:[%s199_s8 + $0x8] sm:$0xff] (%p795_p12) }
  0x33   : > { %v216_v2 = vld [vmem:[%s199_s8 + $0x20] sm:$0xff] (%p795_p12)  ;;  %213 = vst [vmem:[%s196_s6] sm:$0xff] (%p795_p12), %v212_v0  ;;  %215 = vst [vmem:[%s196_s6 + $0x8] sm:$0xff] (%p795_p12), %v214_v1  ;;  %v218_v3 = vld [vmem:[%s199_s8 + $0x28] sm:$0xff] (%p795_p12) }
  0x34   : > { %217 = vst [vmem:[%s196_s6 + $0x10] sm:$0xff] (%p795_p12), %v216_v2  ;;  %v220_v4 = vld [vmem:[%s199_s8 + $0x40] sm:$0xff] (%p795_p12)  ;;  %v222_v5 = vld [vmem:[%s199_s8 + $0x48] sm:$0xff] (%p795_p12)  ;;  %219 = vst [vmem:[%s196_s6 + $0x18] sm:$0xff] (%p795_p12), %v218_v3 }
  0x35   : > { %221 = vst [vmem:[%s196_s6 + $0x20] sm:$0xff] (%p795_p12), %v220_v4  ;;  %223 = vst [vmem:[%s196_s6 + $0x28] sm:$0xff] (%p795_p12), %v222_v5  ;;  %v224_v6 = vld [vmem:[%s199_s8 + $0x60] sm:$0xff] (%p795_p12)  ;;  %v226_v7 = vld [vmem:[%s199_s8 + $0x68] sm:$0xff] (%p795_p12) }
  0x36   : > { %225 = vst [vmem:[%s196_s6 + $0x30] sm:$0xff] %v224_v6  ;;  %227 = vst [vmem:[%s196_s6 + $0x38] sm:$0xff] %v226_v7 }
  0x37 PF: > { %p796_p4 = scmp.ne.s32.totalorder %s793_s28, 0 }
  0x38   : > { %p797_p6 = scmp.ne.s32.totalorder (!%p796_p4), %s792_s27, 0 }
  0x39   : > { %236 = sbr.rel (%p796_p4) target bundleno = 301 (0x12d), region = 55 }
  0x40   : > { %626 = dma.done.wait (%p797_p6), [#allocation3], 64  }
  0x41   : > { %628 = vsyncadd (%p797_p6), [#allocation3], 4294967232  ;;  %s243_s26 = sand.u32 1, %s631_s18   ;;  %v642_v8 = vmov 0.0   ;;  %v643_v9 = vmov 0   ;;  %vm301_vm0 = vcmask 1042432  }
  0x42   : > { %s525_s30 = sshll.u32 %s243_s26, 6  ;;  %372 = vmatprep.mubr.f32.mxu0 %v642_v8  ;;  %584 = vset.pattern.permute.xlu0 %v643_v9  ;;  %vm644_vm1 = vmmov 1   ;;  %v384_v21 = vld [vmem:[%s784_s2] sm:$0xf]  ;;  %vm297_vm3 = vcmask 220160   ;;  %s526_s11 = sshll.u32 %s515_s21, 1 }
  0x43   : > { %s245_s9 = scalar_lea.vmem [#allocation4], %s525_s30  ;;  %vm541_vm2 = vmpackc.low %vm301_vm0, %vm644_vm1  ;;  %387 = vperm.xlu0 %584, %v384_v21   ;;  %v392_v23 = vld [vmem:[%s785_s3] sm:$0xf]  ;;  %p277_p7 = scmp.lt.s32.totalorder %s526_s11, 3 }
  0x44   : > { %v290_v10 = vld [vmem:[%s245_s9 + $0x8] sm:$0xff]  ;;  %v292_v11 = vld [vmem:[%s245_s9 + $0x18] sm:$0xff]  ;;  %v289_v12 = vld [vmem:[%s245_s9] sm:$0xff] }
  0x45   : > { %v536_v13 = vpack.c.bf16 %v292_v11, %v290_v10  ;;  %v291_v14 = vld [vmem:[%s245_s9 + $0x10] sm:$0xff]  ;;  %v294_v15 = vld [vmem:[%s245_s9 + $0x28] sm:$0xff]  ;;  %v296_v16 = vld [vmem:[%s245_s9 + $0x38] sm:$0x7]  ;;  %s802_s11 = smov (!%p277_p7, %s526_s11), 3 }
  0x46   : > { %v538_v17 = vpack.c.bf16 %v291_v14, %v289_v12  ;;  %v540_v18 = vpack.c.bf16 %v296_v16, %v294_v15  ;;  %v293_v19 = vld [vmem:[%s245_s9 + $0x20] sm:$0xff]  ;;  %v295_v20 = vld [vmem:[%s245_s9 + $0x30] sm:$0x7]  ;;  %v288_v24 = vld [vmem:[#allocation2] sm:$0xf]  ;;  %s527_s12 = sshll.u32 %s802_s11, 2 }
  0x47   : > { %537 = vmatprep.subr.bf16.mxu0 %v536_v13  ;;  %v543_v22 = vpack.c.bf16 %v295_v20, %v293_v19  ;;  %395 = vperm.xlu0 %584, %v392_v23   ;;  %s280_s15 = scalar_lea.vmem %s786_s4, %s527_s12  ;;  %s286_s16 = scalar_lea.vmem %s787_s5, %s527_s12 }
  0x48   : > { %539 = vmatpush1.bf16.msra.mxu0 %v538_v17 }
  0x49   : > { %542 = vmatprep.subr.msk.bf16.mxu0 %vm541_vm2, %v540_v18 }
  0x4c   : > { %545 = vmatpush1.bf16.msk.msra.mxu0 %vm541_vm2, %v543_v22 }
  0x4f   : > { %532 = vmatmul.mubr.msk.f32.vlgmr.msra.gmra.mrb[0].mxu0 %vm297_vm3, %v288_v24 }
  0xc2   : > { %v388_v25 = vpop.permute.xlu0 %387 }
  0xc6   : > { %v396_v29 = vpop.permute.xlu0 %395 }
 0x122   : > { %v374_v26 = vpop.f32.mrb[0].mxu0 }
 0x123   : > { %v390_v27 = vmul.f32 %v388_v25, %v374_v26  ;;  %v376_v28 = vpop.f32.mrb[1].mxu0 }
 0x124   : > { %v381_v30 = vcombine.low %v374_v26, %v376_v28  ;;  %v391_v31 = vmul.f32 %v388_v25, %v376_v28 }
 0x125   : > { %v398_v32 = vadd.f32 %v396_v29, %v390_v27 }
 0x126   : > { %383 = vst [vmem:[%s280_s15] sm:$0xff] %v381_v30  ;;  %v399_v33 = vadd.f32 %v396_v29, %v391_v31 }
 0x127   : > { %v400_v34 = vmax.f32 %v398_v32, 0.0 }
 0x128   : > { %v401_v35 = vmax.f32 %v399_v33, 0.0 }
 0x12a   : > { %v404_v36 = vcombine.low %v400_v34, %v401_v35 }
 0x12c   : > { %406 = vst [vmem:[%s286_s16] sm:$0xff] %v404_v36 }
 0x12d PF: > { %p14_p9 = scmp.ge.s32.totalorder %s692_s22, 4   ;;  %s798_s18 = smov %s635_s19 }
 0x12e   : > { %s799_s19 = smov %s702_s25  ;;  %s800_s20 = smov %s692_s22 }
 0x12f   :  { %16 = sbr.rel (!%p14_p9) target bundleno = 2 (0x2), region = 111 }
 0x136   :  { %446 = vsyncpa [#allocation3], 1 }
 0x137   :  { %448 = vsyncpa [#allocation3 + $0x1], 1 }

// kernel: forward.9
= control target key start
LH: loop header
LB: loop body
LE: loop exit
PB: predicated region body
PF: predicated region fallthrough
CT: control target
= control target key end

     0   :  { %s519_s15 = smov 0   ;;  %s521_s16 = smov 0   ;;  %s580_s0 = inlined_call_operand.vmem [shape: f32[4,36], index: 0, kind: input, shape index: {}]   ;;  %s581_s1 = inlined_call_operand.vmem [shape: f32[36,512], index: 1, kind: input, shape index: {}]   ;;  %s582_s2 = inlined_call_operand.vmem [shape: f32[4,1], index: 2, kind: input, shape index: {}]   ;;  %s583_s3 = inlined_call_operand.vmem [shape: f32[4,1], index: 3, kind: input, shape index: {}]   ;;  %s584_s4 = inlined_call_operand.vmem [shape: f32[4,512], index: 4, kind: output, shape index: {}]  }
   0x1   :  { %s523_s17 = smov 0  }
   0x2 LB: > { %s416_s18 = sadd.s32 4294967295, %s490_s17   ;;  %s536_s19 = sadd.s32 1, %s490_s17   ;;  %s490_s17 = sphi %s523_s17, %s587_s17   ;;  %s486_s16 = sphi %s521_s16, %s586_s16   ;;  %s482_s15 = sphi %s519_s15, %s585_s15  }
   0x3   : > { %s39_s20 = ssub.s32 %s490_s17, %s536_s19  ;;  %s42_s21 = sadd.s32 1, %s486_s16 }
   0x4   : > { %p40_p0 = scmp.eq.s32.totalorder %s39_s20, 0  ;;  %p49_p1 = scmp.ne.s32.totalorder %s486_s16, %s482_s15 }
   0x5   : > { %p50_p2 = scmp.eq.s32.totalorder %s490_s17, 0  ;;  %p419_p4 = scmp.ge.s32.totalorder %s490_s17, 2 }
   0x6   : > { %s545_s22 = scalar_select %p40_p0, %s486_s16, %s42_s21  }
   0x7   : > { %p51_p3 = por %p50_p2, %p49_p1  ;;  %152 = sbr.rel (%p419_p4) target bundleno = 23 (0x17), region = 28 }
   0xe   : > { %155 = sbr.rel (!%p51_p3) target bundleno = 23 (0x17), region = 32  ;;  %s157_s23 = sand.u32 (%p51_p3), 1, %s486_s16  }
   0xf   : > { %s430_s24 = sshll.u32 (%p51_p3), %s490_s17, 4  ;;  %s439_s25 = smul.u32 (%p51_p3), 80, %s157_s23 }
  0x10   : > { %s162_s28 = scalar_lea.vmem (%p51_p3), %s581_s1, %s430_s24 }
  0x11   : > { %v175_v0 = vld [vmem:[%s162_s28] sm:$0xff] (%p51_p3)  ;;  %v177_v1 = vld [vmem:[%s162_s28 + $0x8] sm:$0xff] (%p51_p3)  ;;  %s159_s29 = scalar_lea.vmem (%p51_p3), [#allocation2], %s439_s25 }
  0x12   : > { %v179_v2 = vld [vmem:[%s162_s28 + $0x20] sm:$0xff] (%p51_p3)  ;;  %v181_v3 = vld [vmem:[%s162_s28 + $0x28] sm:$0xff] (%p51_p3)  ;;  %176 = vst [vmem:[%s159_s29] sm:$0xff] (%p51_p3), %v175_v0  ;;  %178 = vst [vmem:[%s159_s29 + $0x8] sm:$0xff] (%p51_p3), %v177_v1 }
  0x13   : > { %v183_v4 = vld [vmem:[%s162_s28 + $0x40] sm:$0xff] (%p51_p3)  ;;  %v185_v5 = vld [vmem:[%s162_s28 + $0x48] sm:$0xff] (%p51_p3)  ;;  %180 = vst [vmem:[%s159_s29 + $0x10] sm:$0xff] (%p51_p3), %v179_v2  ;;  %182 = vst [vmem:[%s159_s29 + $0x18] sm:$0xff] (%p51_p3), %v181_v3 }
  0x14   : > { %184 = vst [vmem:[%s159_s29 + $0x20] sm:$0xff] (%p51_p3), %v183_v4  ;;  %186 = vst [vmem:[%s159_s29 + $0x28] sm:$0xff] (%p51_p3), %v185_v5  ;;  %v187_v6 = vld [vmem:[%s162_s28 + $0x60] sm:$0xff] (%p51_p3)  ;;  %v189_v7 = vld [vmem:[%s162_s28 + $0x68] sm:$0xff] (%p51_p3) }
  0x15   : > { %v191_v8 = vld [vmem:[%s162_s28 + $0x80] sm:$0xff]  ;;  %188 = vst [vmem:[%s159_s29 + $0x30] sm:$0xff] %v187_v6  ;;  %190 = vst [vmem:[%s159_s29 + $0x38] sm:$0xff] %v189_v7  ;;  %v193_v9 = vld [vmem:[%s162_s28 + $0x88] sm:$0xff] }
  0x16   : > { %192 = vst [vmem:[%s159_s29 + $0x40] sm:$0xff] %v191_v8  ;;  %194 = vst [vmem:[%s159_s29 + $0x48] sm:$0xff] %v193_v9 }
  0x17 PF: > { %p422_p5 = scmp.ge.s32.totalorder %s490_s17, 1  ;;  %p199_p6 = scmp.lt.s32.totalorder %s490_s17, 3 }
  0x19   : > { %p200_p7 = pnand %p422_p5, %p199_p6 }
  0x1a   : > { %s206_s30 = sand.u32 (!%p200_p7), 1, %s482_s15   ;;  %v492_v10 = vmov (!%p200_p7), 0.0   ;;  %v331_v11 = vld [vmem:[%s582_s2] sm:$0xf] (!%p200_p7)  ;;  %v493_v12 = vmov (!%p200_p7), 0   ;;  %vm253_vm0 = vcmask (!%p200_p7), 1043456  }
  0x1b   : > { %203 = sbr.rel (%p200_p7) target bundleno = 266 (0x10a), region = 55  ;;  %324 = vmatprep.mubr.f32.mxu0 (!%p200_p7), %v492_v10  ;;  %467 = vset.pattern.permute.xlu0 (!%p200_p7), %v493_v12  ;;  %v339_v13 = vld [vmem:[%s583_s3] sm:$0xf] (!%p200_p7)  ;;  %vm249_vm1 = vcmask (!%p200_p7), 293888   ;;  %s423_s13 = sshll.u32 (!%p200_p7), %s416_s18, 1 }
  0x1c   : > { %s440_s5 = smul.u32 (!%p200_p7), 80, %s206_s30  ;;  %334 = vperm.xlu0 (!%p200_p7), %467, %v331_v11   ;;  %v238_v28 = vld [vmem:[%s580_s0] sm:$0xf] (!%p200_p7)  ;;  %p233_p8 = scmp.lt.s32.totalorder (!%p200_p7), %s423_s13, 3 }
  0x1e   : > { %s208_s10 = scalar_lea.vmem (!%p200_p7), [#allocation2], %s440_s5 }
  0x1f   : > { %v240_v14 = vld [vmem:[%s208_s10 + $0x8] sm:$0xff] (!%p200_p7)  ;;  %v242_v15 = vld [vmem:[%s208_s10 + $0x18] sm:$0xff] (!%p200_p7)  ;;  %v239_v16 = vld [vmem:[%s208_s10] sm:$0xff] (!%p200_p7) }
  0x20   : > { %v431_v17 = vpack.c.bf16 (!%p200_p7), %v242_v15, %v240_v14  ;;  %v241_v18 = vld [vmem:[%s208_s10 + $0x10] sm:$0xff] (!%p200_p7)  ;;  %v244_v19 = vld [vmem:[%s208_s10 + $0x28] sm:$0xff] (!%p200_p7)  ;;  %v246_v20 = vld [vmem:[%s208_s10 + $0x38] sm:$0xff] (!%p200_p7)  ;;  %342 = vperm.xlu0 (!%p200_p7), %467, %v339_v13  }
  0x21   : > { %v433_v21 = vpack.c.bf16 (!%p200_p7), %v241_v18, %v239_v16  ;;  %v435_v22 = vpack.c.bf16 (!%p200_p7), %v246_v20, %v244_v19  ;;  %v243_v23 = vld [vmem:[%s208_s10 + $0x20] sm:$0xff] (!%p200_p7)  ;;  %v245_v24 = vld [vmem:[%s208_s10 + $0x30] sm:$0xff] (!%p200_p7)  ;;  %v248_v26 = vld [vmem:[%s208_s10 + $0x48] sm:$0xf] (!%p200_p7) }
  0x22   : > { %432 = vmatprep.subr.bf16.mxu0 %v431_v17  ;;  %v437_v25 = vpack.c.bf16 %v245_v24, %v243_v23  ;;  %v247_v27 = vld [vmem:[%s208_s10 + $0x40] sm:$0xf]  ;;  %s589_s13 = smov (!%p233_p8, %s423_s13), 3 }
  0x23   : > { %434 = vmatpush1.bf16.msra.mxu0 %v433_v21  ;;  %s424_s14 = sshll.u32 %s589_s13, 2 }
  0x24   : > { %436 = vmatprep.subr.bf16.mxu0 %v435_v22  ;;  %s236_s21 = scalar_lea.vmem %s584_s4, %s424_s14 }
  0x27   : > { %438 = vmatpush1.bf16.msra.mxu0 %v437_v25 }
  0x28   : > { %425 = vmatprep.subr.msk.mxu0 %vm253_vm0, %v248_v26 }
  0x2b   : > { %426 = vmatpush1.msk.msra.mxu0 %vm253_vm0, %v247_v27 }
  0x2c   : > { %427 = vmatmul.mubr.msk.f32.vlgmr.msra.gmra.mrb[0].mxu0 %vm249_vm1, %v238_v28 }
  0x9b   : > { %v335_v29 = vpop.permute.xlu0 %334 }
  0x9f   : > { %v343_v33 = vpop.permute.xlu0 %342 }
  0xff   : > { %v326_v30 = vpop.f32.mrb[0].mxu0 }
 0x100   : > { %v337_v31 = vmul.f32 %v335_v29, %v326_v30  ;;  %v328_v32 = vpop.f32.mrb[1].mxu0 }
 0x101   : > { %v338_v34 = vmul.f32 %v335_v29, %v328_v32 }
 0x102   : > { %v345_v35 = vadd.f32 %v343_v33, %v337_v31 }
 0x103   : > { %v346_v36 = vadd.f32 %v343_v33, %v338_v34 }
 0x104   : > { %v347_v37 = vmax.f32 %v345_v35, 0.0 }
 0x105   : > { %v348_v38 = vmax.f32 %v346_v36, 0.0 }
 0x107   : > { %v351_v39 = vcombine.low %v347_v37, %v348_v38 }
 0x109   : > { %353 = vst [vmem:[%s236_s21] sm:$0xff] %v351_v39 }
 0x10a PF: > { %p11_p9 = scmp.ge.s32.totalorder %s536_s19, 4   ;;  %s585_s15 = smov %s486_s16 }
 0x10b   : > { %s586_s16 = smov %s545_s22  ;;  %s587_s17 = smov %s536_s19 }
 0x10c   :  { %13 = sbr.rel (!%p11_p9) target bundleno = 2 (0x2), region = 94 }

// kernel: forward.10
= control target key start
LH: loop header
LB: loop body
LE: loop exit
PB: predicated region body
PF: predicated region fallthrough
CT: control target
= control target key end

     0   :  { %s1031_s30 = smov 0   ;;  %s1033_s10 = smov 0   ;;  %s1181_s0 = inlined_call_operand.vmem [shape: f32[4,36], index: 0, kind: input, shape index: {}]   ;;  %s1182_s1 = inlined_call_operand.vmem [shape: f32[36,512], index: 1, kind: input, shape index: {}]   ;;  %s1183_s2 = inlined_call_operand.vmem [shape: f32[4,512], index: 2, kind: input, shape index: {}]   ;;  %s1184_s3 = inlined_call_operand.vmem [shape: f32[128,2], index: 3, kind: input, shape index: {}]   ;;  %s1185_s4 = inlined_call_operand.vmem [shape: f32[4,128], index: 4, kind: input, shape index: {}]   ;;  %s1186_s5 = inlined_call_operand.vmem [shape: f32[4,1], index: 5, kind: input, shape index: {}, may-alias: {5,8}]   ;;  %s1187_s6 = inlined_call_operand.vmem [shape: f32[2,512], index: 6, kind: input, shape index: {}]   ;;  %s1188_s7 = inlined_call_operand.vmem [shape: f32[4,1], index: 7, kind: input, shape index: {}]   ;;  %s1189_s8 = inlined_call_operand.vmem [shape: f32[4,1], index: 8, kind: input, shape index: {}, may-alias: {5,8}]   ;;  %s1190_s9 = inlined_call_operand.vmem [shape: f32[4,512], index: 9, kind: output, shape index: {}]  }
   0x1   :  { %s1035_s11 = smov 0  }
   0x2 LB: > { %s809_s12 = sadd.s32 4294967295, %s975_s11   ;;  %s1048_s13 = sadd.s32 1, %s975_s11   ;;  %s975_s11 = sphi %s1035_s11, %s1193_s11   ;;  %s971_s10 = sphi %s1033_s10, %s1192_s10   ;;  %s967_s30 = sphi %s1031_s30, %s1191_s30  }
   0x3   : > { %s44_s14 = ssub.s32 %s975_s11, %s1048_s13  ;;  %s47_s15 = sadd.s32 1, %s971_s10 }
   0x4   : > { %p45_p0 = scmp.eq.s32.totalorder %s44_s14, 0  ;;  %p54_p1 = scmp.ne.s32.totalorder %s971_s10, %s967_s30 }
   0x5   : > { %p55_p2 = scmp.eq.s32.totalorder %s975_s11, 0  ;;  %p812_p4 = scmp.ge.s32.totalorder %s975_s11, 2 }
   0x6   : > { %s1057_s16 = scalar_select %p45_p0, %s971_s10, %s47_s15  }
   0x7   : > { %p56_p3 = por %p55_p2, %p54_p1  ;;  %281 = sbr.rel (%p812_p4) target bundleno = 23 (0x17), region = 40 }
   0xe   : > { %284 = sbr.rel (!%p56_p3) target bundleno = 23 (0x17), region = 44  ;;  %s286_s17 = sand.u32 (%p56_p3), 1, %s971_s10  }
   0xf   : > { %s831_s18 = sshll.u32 (%p56_p3), %s975_s11, 4  ;;  %s920_s19 = smul.u32 (%p56_p3), 80, %s286_s17 }
  0x10   : > { %s291_s22 = scalar_lea.vmem (%p56_p3), %s1182_s1, %s831_s18 }
  0x11   : > { %v304_v0 = vld [vmem:[%s291_s22] sm:$0xff] (%p56_p3)  ;;  %v306_v1 = vld [vmem:[%s291_s22 + $0x8] sm:$0xff] (%p56_p3)  ;;  %s288_s23 = scalar_lea.vmem (%p56_p3), [#allocation2], %s920_s19 }
  0x12   : > { %v308_v2 = vld [vmem:[%s291_s22 + $0x20] sm:$0xff] (%p56_p3)  ;;  %v310_v3 = vld [vmem:[%s291_s22 + $0x28] sm:$0xff] (%p56_p3)  ;;  %305 = vst [vmem:[%s288_s23] sm:$0xff] (%p56_p3), %v304_v0  ;;  %307 = vst [vmem:[%s288_s23 + $0x8] sm:$0xff] (%p56_p3), %v306_v1 }
  0x13   : > { %v312_v4 = vld [vmem:[%s291_s22 + $0x40] sm:$0xff] (%p56_p3)  ;;  %v314_v5 = vld [vmem:[%s291_s22 + $0x48] sm:$0xff] (%p56_p3)  ;;  %309 = vst [vmem:[%s288_s23 + $0x10] sm:$0xff] (%p56_p3), %v308_v2  ;;  %311 = vst [vmem:[%s288_s23 + $0x18] sm:$0xff] (%p56_p3), %v310_v3 }
  0x14   : > { %313 = vst [vmem:[%s288_s23 + $0x20] sm:$0xff] (%p56_p3), %v312_v4  ;;  %315 = vst [vmem:[%s288_s23 + $0x28] sm:$0xff] (%p56_p3), %v314_v5  ;;  %v316_v6 = vld [vmem:[%s291_s22 + $0x60] sm:$0xff] (%p56_p3)  ;;  %v318_v7 = vld [vmem:[%s291_s22 + $0x68] sm:$0xff] (%p56_p3) }
  0x15   : > { %v320_v8 = vld [vmem:[%s291_s22 + $0x80] sm:$0xff]  ;;  %317 = vst [vmem:[%s288_s23 + $0x30] sm:$0xff] %v316_v6  ;;  %319 = vst [vmem:[%s288_s23 + $0x38] sm:$0xff] %v318_v7  ;;  %v322_v9 = vld [vmem:[%s291_s22 + $0x88] sm:$0xff] }
  0x16   : > { %321 = vst [vmem:[%s288_s23 + $0x40] sm:$0xff] %v320_v8  ;;  %323 = vst [vmem:[%s288_s23 + $0x48] sm:$0xff] %v322_v9 }
  0x17 PF: > { %p815_p5 = scmp.ge.s32.totalorder %s975_s11, 1  ;;  %p346_p6 = scmp.lt.s32.totalorder %s975_s11, 3 }
  0x19   : > { %p347_p7 = pnand %p815_p5, %p346_p6 }
  0x1a   : > { %v515_v10 = vld [vmem:[%s1184_s3] sm:$0xff] (!%p347_p7)  ;;  %v516_v11 = vld [vmem:[%s1184_s3 + $0x8] sm:$0xff] (!%p347_p7)  ;;  %v517_v12 = vld [vmem:[%s1184_s3 + $0x10] sm:$0xff] (!%p347_p7)  ;;  %v977_v13 = vmov (!%p347_p7), 0.0|0.0   ;;  %vm978_vm0 = vmmov (!%p347_p7), 0   ;;  %v979_v16 = vmov (!%p347_p7), 0.0  }
  0x1b   : > { %350 = sbr.rel (%p347_p7) target bundleno = 500 (0x1f4), region = 75  ;;  %892 = vmatprep.subr.bf16.mxu1 (!%p347_p7), %v977_v13  ;;  %v893_v14 = vpack.c.bf16 (!%p347_p7), %v516_v11, %v515_v10  ;;  %v518_v15 = vld [vmem:[%s1184_s3 + $0x18] sm:$0xff] (!%p347_p7)  ;;  %881 = vmatprep.mubr.msk.f32.mxu1 (!%p347_p7), %vm978_vm0, %v979_v16  ;;  %s353_s17 = sand.u32 (!%p347_p7), 1, %s967_s30   ;;  %v980_v17 = vmov (!%p347_p7), 0   ;;  %v519_v19 = vld [vmem:[%s1184_s3 + $0x20] sm:$0xff] (!%p347_p7)  ;;  %v520_v20 = vld [vmem:[%s1184_s3 + $0x28] sm:$0xff] (!%p347_p7) }
  0x1c   : > { %950 = vset.pattern.permute.xlu0 (!%p347_p7), %v980_v17  ;;  %s921_s18 = smul.u32 (!%p347_p7), 80, %s353_s17  ;;  %507 = vmatprep.mubr.f32.mxu0 (!%p347_p7), %v979_v16  ;;  %v896_v18 = vpack.c.bf16 (!%p347_p7), %v518_v15, %v517_v12  ;;  %v531_v21 = vld [vmem:[%s1186_s5] sm:$0xf] (!%p347_p7)  ;;  %s816_s24 = sshll.u32 (!%p347_p7), %s809_s12, 1  ;;  %v521_v22 = vld [vmem:[%s1184_s3 + $0x30] sm:$0xff] (!%p347_p7)  ;;  %v522_v23 = vld [vmem:[%s1184_s3 + $0x38] sm:$0xff] (!%p347_p7)  ;;  %v899_v27 = vpack.c.bf16 (!%p347_p7), %v520_v20, %v519_v19 }
  0x1d   : > { %894 = vmatpush3.bf16.msra.mxu1 (!%p347_p7), %v893_v14  ;;  %951 = vset.pattern.permute.xlu1 (!%p347_p7), %v980_v17  ;;  %v700_v24 = vld [vmem:[%s1188_s7] sm:$0xf] (!%p347_p7)  ;;  %p400_p8 = scmp.lt.s32.totalorder (!%p347_p7), %s816_s24, 3  ;;  %v902_v38 = vpack.c.bf16 (!%p347_p7), %v522_v23, %v521_v22  ;;  %v524_v40 = vld [vmem:[%s1184_s3 + $0x48] sm:$0xff] (!%p347_p7)  ;;  %vm436_vm1 = vcmask (!%p347_p7), 1043456   ;;  %v525_v46 = vld [vmem:[%s1184_s3 + $0x50] sm:$0xff] (!%p347_p7) }
  0x1e   : > { %895 = vmatprep.subr.bf16.mxu1 (!%p347_p7), %v977_v13  ;;  %534 = vperm.xlu0 (!%p347_p7), %950, %v531_v21   ;;  %s1104_s15 = scalar_lea.vmem (!%p347_p7), [#allocation2], %s921_s18  ;;  %v523_v39 = vld [vmem:[%s1184_s3 + $0x40] sm:$0xff] (!%p347_p7)  ;;  %v526_v47 = vld [vmem:[%s1184_s3 + $0x58] sm:$0xff] (!%p347_p7)  ;;  %vm622_vm2 = vcmask (!%p347_p7), 1041408   ;;  %vm432_vm3 = vcmask (!%p347_p7), 293888   ;;  %v528_v51 = vld [vmem:[%s1184_s3 + $0x68] sm:$0xff] (!%p347_p7) }
  0x1f   : > { %v419_v25 = vld [vmem:[%s1104_s15 + $0x8] sm:$0xff] (!%p347_p7)  ;;  %v421_v26 = vld [vmem:[%s1104_s15 + $0x18] sm:$0xff] (!%p347_p7)  ;;  %v418_v29 = vld [vmem:[%s1104_s15] sm:$0xff] (!%p347_p7)  ;;  %v905_v43 = vpack.c.bf16 (!%p347_p7), %v524_v40, %v523_v39  ;;  %v908_v49 = vpack.c.bf16 (!%p347_p7), %v526_v47, %v525_v46  ;;  %vm618_vm4 = vcmask (!%p347_p7), 15360  }
  0x20   : > { %v884_v28 = vpack.c.bf16 (!%p347_p7), %v421_v26, %v419_v25  ;;  %v420_v30 = vld [vmem:[%s1104_s15 + $0x10] sm:$0xff] (!%p347_p7)  ;;  %v423_v31 = vld [vmem:[%s1104_s15 + $0x28] sm:$0xff] (!%p347_p7)  ;;  %v425_v33 = vld [vmem:[%s1104_s15 + $0x38] sm:$0xff] (!%p347_p7) }
  0x21   : > { %897 = vmatpush3.bf16.msra.mxu1 (!%p347_p7), %v896_v18  ;;  %v886_v32 = vpack.c.bf16 (!%p347_p7), %v420_v30, %v418_v29  ;;  %v422_v34 = vld [vmem:[%s1104_s15 + $0x20] sm:$0xff] (!%p347_p7)  ;;  %v424_v35 = vld [vmem:[%s1104_s15 + $0x30] sm:$0xff] (!%p347_p7)  ;;  %v888_v36 = vpack.c.bf16 (!%p347_p7), %v425_v33, %v423_v31  ;;  %v427_v41 = vld [vmem:[%s1104_s15 + $0x48] sm:$0xf] (!%p347_p7) }
  0x22   : > { %898 = vmatprep.subr.bf16.mxu1 %v977_v13  ;;  %s1195_s24 = smov (!%p400_p8, %s816_s24), 3  ;;  %885 = vmatprep.subr.bf16.mxu0 %v884_v28  ;;  %v890_v37 = vpack.c.bf16 %v424_v35, %v422_v34  ;;  %v426_v44 = vld [vmem:[%s1104_s15 + $0x40] sm:$0xf]  ;;  %v530_v54 = vld [vmem:[%s1184_s3 + $0x78] sm:$0xff] }
  0x23   : > { %703 = vperm.xlu0 %950, %v700_v24   ;;  %887 = vmatpush1.bf16.msra.mxu0 %v886_v32  ;;  %s819_s11 = sshll.u32 %s1195_s24, 1  ;;  %v417_v48 = vld [vmem:[%s1181_s0] sm:$0xf]  ;;  %v529_v53 = vld [vmem:[%s1184_s3 + $0x70] sm:$0xff]  ;;  %s817_s30 = sshll.u32 %s1195_s24, 2 }
  0x24   : > { %889 = vmatprep.subr.bf16.mxu0 %v888_v36  ;;  %s409_s22 = scalar_lea.vmem %s1187_s6, %s819_s11  ;;  %v527_v50 = vld [vmem:[%s1184_s3 + $0x60] sm:$0xff]  ;;  %v914_v55 = vpack.c.bf16 %v530_v54, %v529_v53  ;;  %s403_s27 = scalar_lea.vmem %s1183_s2, %s817_s30 }
  0x25   : > { %900 = vmatpush3.bf16.msra.mxu1 %v899_v27  ;;  %v825_v42 = vld.sshfl [vmem:[%s409_s22] sm:$0x33 pattern:$0x76325410]  ;;  %v911_v52 = vpack.c.bf16 %v528_v51, %v527_v50  ;;  %s415_s29 = scalar_lea.vmem %s1190_s9, %s817_s30 }
  0x26   : > { %901 = vmatprep.subr.bf16.mxu1 %v977_v13  ;;  %v617_v45 = vcombine.high %v825_v42, %v825_v42  ;;  %v514_v56 = vld [vmem:[%s1185_s4] sm:$0xf] }
  0x27   : > { %891 = vmatpush1.bf16.msra.mxu0 %v890_v37  ;;  %v708_v57 = vld [vmem:[%s1189_s8] sm:$0xf] }
  0x28   : > { %822 = vmatprep.subr.msk.mxu0 %vm436_vm1, %v427_v41  ;;  %711 = vperm.xlu1 %951, %v708_v57   ;;  %v428_v63 = vld [vmem:[%s403_s27] sm:$0xff] }
  0x29   : > { %903 = vmatpush3.bf16.msra.mxu1 %v902_v38  ;;  %v430_v0 = vcombine.high %v428_v63, %v428_v63 }
  0x2a   : > { %904 = vmatprep.subr.bf16.mxu1 %v977_v13 }
  0x2b   : > { %823 = vmatpush1.msk.msra.mxu0 %vm436_vm1, %v426_v44 }
  0x2c   : > { %826 = vmatprep.subr.msk.mxu0 %vm622_vm2, %v617_v45  ;;  %824 = vmatmul.mubr.msk.f32.vlgmr.msra.gmra.mrb[0].mxu0 %vm432_vm3, %v417_v48 }
  0x2d   : > { %906 = vmatpush3.bf16.msra.mxu1 %v905_v43  ;;  %827 = vmatpush1.msk.msra.mxu0 %vm622_vm2, %v825_v42 }
  0x2e   : > { %907 = vmatprep.subr.bf16.mxu1 %v977_v13  ;;  %691 = vmatprep.mubr.f32.mxu0 %v979_v16 }
  0x31   : > { %909 = vmatpush3.bf16.msra.mxu1 %v908_v49 }
  0x32   : > { %910 = vmatprep.subr.bf16.mxu1 %v977_v13 }
  0x35   : > { %912 = vmatpush3.bf16.msra.mxu1 %v911_v52 }
  0x36   : > { %913 = vmatprep.subr.bf16.mxu1 %v977_v13 }
  0x39   : > { %915 = vmatpush3.bf16.msra.mxu1 %v914_v55 }
  0x3c   : > { %882 = vmatmul.mubr.f32.vlgmr.msra.gmra.mrb[0].mxu1 %v514_v56 }
  0x9d   : > { %v535_v58 = vpop.permute.xlu0 %534 }
  0xa2   : > { %v704_v4 = vpop.permute.xlu0 %703 }
  0xa7   : > { %v712_v6 = vpop.permute.xlu1 %711 }
 0x10f   : > { %v603_v59 = vpop.f32.mrb[0].mxu1 }
 0x110   : > { %v604_v60 = vadd.f32 %v603_v59, %v535_v58  ;;  %v883_v61 = vpop.f32.mrb[1].mxu1 }
 0x112   : > { %v607_v62 = vmax.f32 %v604_v60, 0.0 }
 0x114   : > { %828 = vmatmul.mubr.msk.f32.vlgmr.msra.gmra.mrb[0].mxu0 %vm618_vm4, %v607_v62 }
 0x1e7   : > { %v693_v1 = vpop.f32.mrb[0].mxu0 }
 0x1e8   : > { %v916_v2 = vadd.f32 %v693_v1, %v428_v63  ;;  %v695_v3 = vpop.f32.mrb[1].mxu0 }
 0x1e9   : > { %v917_v5 = vadd.f32 %v695_v3, %v430_v0 }
 0x1ea   : > { %v706_v7 = vmul.f32 %v916_v2, %v704_v4 }
 0x1eb   : > { %v707_v8 = vmul.f32 %v917_v5, %v704_v4 }
 0x1ec   : > { %v714_v9 = vadd.f32 %v712_v6, %v706_v7 }
 0x1ed   : > { %v715_v10 = vadd.f32 %v712_v6, %v707_v8 }
 0x1ee   : > { %v716_v11 = vmax.f32 %v714_v9, 0.0 }
 0x1ef   : > { %v717_v12 = vmax.f32 %v715_v10, 0.0 }
 0x1f1   : > { %v720_v13 = vcombine.low %v716_v11, %v717_v12 }
 0x1f3   : > { %722 = vst [vmem:[%s415_s29] sm:$0xff] %v720_v13 }
 0x1f4 PF: > { %p16_p9 = scmp.ge.s32.totalorder %s1048_s13, 4   ;;  %s1191_s30 = smov %s971_s10 }
 0x1f5   : > { %s1192_s10 = smov %s1057_s16  ;;  %s1193_s11 = smov %s1048_s13 }
 0x1f6   :  { %18 = sbr.rel (!%p16_p9) target bundleno = 2 (0x2), region = 120 }

// kernel: forward.11
= control target key start
LH: loop header
LB: loop body
LE: loop exit
PB: predicated region body
PF: predicated region fallthrough
CT: control target
= control target key end

     0   :  { %v153_v0 = vmov 0.0|0.0   ;;  %vm154_vm0 = vmmov 0   ;;  %v155_v4 = vmov 0.0   ;;  %v156_v7 = vmov 0   ;;  %s209_s1 = inlined_call_operand.vmem [shape: f32[36,128], index: 1, kind: input, shape index: {}]   ;;  %s210_s2 = inlined_call_operand.vmem [shape: f32[8,1], index: 2, kind: input, shape index: {}]   ;;  %s211_s3 = inlined_call_operand.vmem [shape: f32[8,1], index: 3, kind: input, shape index: {}]   ;;  %s212_s0 = inlined_call_operand.vmem [shape: f32[8,36], index: 0, kind: input, shape index: {}]   ;;  %s213_s4 = inlined_call_operand.vmem [shape: f32[8,128], index: 4, kind: output, shape index: {}]  }
   0x1   :  { %142 = vmatprep.subr.bf16.mxu0 %v153_v0  ;;  %v18_v1 = vld [vmem:[%s209_s1] sm:$0xff]  ;;  %v19_v2 = vld [vmem:[%s209_s1 + $0x8] sm:$0xff]  ;;  %v20_v3 = vld [vmem:[%s209_s1 + $0x10] sm:$0xff]  ;;  %139 = vmatprep.mubr.msk.f32.mxu0 %vm154_vm0, %v155_v4  ;;  %vm27_vm1 = vcmask 1043456   ;;  %vm23_vm2 = vcmask 293888  }
   0x2   :  { %v143_v5 = vpack.c.bf16 %v19_v2, %v18_v1  ;;  %v21_v6 = vld [vmem:[%s209_s1 + $0x18] sm:$0xff]  ;;  %152 = vset.pattern.permute.xlu0 %v156_v7  ;;  %v101_v8 = vld [vmem:[%s210_s2] sm:$0xff] }
   0x3   :  { %v146_v9 = vpack.c.bf16 %v21_v6, %v20_v3  ;;  %104 = vperm.xlu0 %152, %v101_v8   ;;  %v108_v10 = vld [vmem:[%s211_s3] sm:$0xff] }
   0x4   :  { %144 = vmatpush3.bf16.msra.mxu0 %v143_v5  ;;  %v22_v11 = vld [vmem:[%s209_s1 + $0x20] sm:$0xf] }
   0x5   :  { %145 = vmatprep.subr.bf16.mxu0 %v153_v0  ;;  %v17_v12 = vld [vmem:[%s212_s0] sm:$0xff] }
   0x7   :  { %111 = vperm.xlu0 %152, %v108_v10  }
   0x8   :  { %147 = vmatpush3.bf16.msra.mxu0 %v146_v9 }
   0x9   :  { %137 = vmatprep.subr.mxu0 %v155_v4 }
   0xc   :  { %138 = vmatpush3.msk.msra.mxu0 %vm27_vm1, %v22_v11 }
   0xd   :  { %140 = vmatmul.mubr.msk.f32.vlgmr.msra.gmra.mrb[0].mxu0 %vm23_vm2, %v17_v12 }
  0x82   :  { %v105_v13 = vpop.permute.xlu0 %104 }
  0x86   :  { %v112_v17 = vpop.permute.xlu0 %111 }
  0xe0   :  { %v97_v14 = vpop.f32.mrb[0].mxu0 }
  0xe1   :  { %v107_v15 = vmul.f32 %v105_v13, %v97_v14  ;;  %v141_v16 = vpop.f32.mrb[1].mxu0 }
  0xe3   :  { %v114_v18 = vadd.f32 %v112_v17, %v107_v15 }
  0xe5   :  { %v115_v19 = vmax.f32 %v114_v18, 0.0 }
  0xe7   :  { %116 = vst [vmem:[%s213_s4] sm:$0xff] %v115_v19 }

// kernel: forward.12
= control target key start
LH: loop header
LB: loop body
LE: loop exit
PB: predicated region body
PF: predicated region fallthrough
CT: control target
= control target key end

     0   :  { %v266_v0 = vmov 0.0|0.0   ;;  %v267_v4 = vmov 0.0   ;;  %vm39_vm0 = vcmask 1043456   ;;  %vm268_vm1 = vmmov 0   ;;  %s350_s1 = inlined_call_operand.vmem [shape: f32[72,128], index: 1, kind: input, shape index: {}]   ;;  %s351_s3 = inlined_call_operand.vmem [shape: f32[4,128], index: 3, kind: input, shape index: {}]   ;;  %s352_s2 = inlined_call_operand.vmem [shape: f32[8,4], index: 2, kind: input, shape index: {}]   ;;  %s353_s4 = inlined_call_operand.vmem [shape: f32[8,1], index: 4, kind: input, shape index: {}]   ;;  %s354_s5 = inlined_call_operand.vmem [shape: f32[8,1], index: 5, kind: input, shape index: {}]   ;;  %s355_s0 = inlined_call_operand.vmem [shape: f32[8,72], index: 0, kind: input, shape index: {}]   ;;  %s356_s6 = inlined_call_operand.vmem [shape: f32[8,128], index: 6, kind: output, shape index: {}]  }
   0x1   :  { %248 = vmatprep.subr.bf16.mxu0 %v266_v0  ;;  %v24_v1 = vld [vmem:[%s350_s1] sm:$0xff]  ;;  %v25_v2 = vld [vmem:[%s350_s1 + $0x8] sm:$0xff]  ;;  %v26_v3 = vld [vmem:[%s350_s1 + $0x10] sm:$0xff]  ;;  %222 = vmatprep.subr.mxu1 %v267_v4  ;;  %vm35_vm2 = vcmask 31744   ;;  %v269_v8 = vmov 0   ;;  %vm113_vm3 = vcmask 588800  }
   0x2   :  { %v249_v5 = vpack.c.bf16 %v25_v2, %v24_v1  ;;  %v27_v6 = vld [vmem:[%s350_s1 + $0x18] sm:$0xff]  ;;  %224 = vmatprep.mubr.msk.f32.mxu1 %vm268_vm1, %v267_v4  ;;  %245 = vmatprep.mubr.msk.f32.mxu0 %vm268_vm1, %v267_v4  ;;  %v34_v7 = vld [vmem:[%s351_s3] sm:$0xf]  ;;  %v29_v12 = vld [vmem:[%s350_s1 + $0x28] sm:$0xff] }
   0x3   :  { %265 = vset.pattern.permute.xlu0 %v269_v8  ;;  %v252_v9 = vpack.c.bf16 %v27_v6, %v26_v3  ;;  %223 = vmatpush3.msk.msra.mxu1 %vm39_vm0, %v34_v7  ;;  %v33_v10 = vld [vmem:[%s352_s2] sm:$0xff]  ;;  %v30_v16 = vld [vmem:[%s350_s1 + $0x30] sm:$0xff]  ;;  %v31_v17 = vld [vmem:[%s350_s1 + $0x38] sm:$0xff] }
   0x4   :  { %250 = vmatpush3.bf16.msra.mxu0 %v249_v5  ;;  %v28_v11 = vld [vmem:[%s350_s1 + $0x20] sm:$0xff]  ;;  %225 = vmatmul.mubr.msk.f32.vlgmr.msra.gmra.mrb[0].mxu1 %vm35_vm2, %v33_v10  ;;  %v258_v18 = vpack.c.bf16 %v31_v17, %v30_v16 }
   0x5   :  { %251 = vmatprep.subr.bf16.mxu0 %v266_v0  ;;  %v187_v13 = vld [vmem:[%s353_s4] sm:$0xff]  ;;  %v255_v15 = vpack.c.bf16 %v29_v12, %v28_v11 }
   0x6   :  { %190 = vperm.xlu0 %265, %v187_v13   ;;  %v194_v14 = vld [vmem:[%s354_s5] sm:$0xff] }
   0x7   :  { %v32_v19 = vld [vmem:[%s350_s1 + $0x40] sm:$0xff] }
   0x8   :  { %253 = vmatpush3.bf16.msra.mxu0 %v252_v9  ;;  %v23_v20 = vld [vmem:[%s355_s0] sm:$0xff] }
   0x9   :  { %254 = vmatprep.subr.bf16.mxu0 %v266_v0 }
   0xa   :  { %197 = vperm.xlu0 %265, %v194_v14  }
   0xc   :  { %256 = vmatpush3.bf16.msra.mxu0 %v255_v15 }
   0xd   :  { %257 = vmatprep.subr.bf16.mxu0 %v266_v0 }
  0x10   :  { %259 = vmatpush3.bf16.msra.mxu0 %v258_v18 }
  0x11   :  { %243 = vmatprep.subr.mxu0 %v267_v4 }
  0x14   :  { %244 = vmatpush3.msra.mxu0 %v32_v19 }
  0x15   :  { %246 = vmatmul.mubr.msk.f32.vlgmr.msra.gmra.mrb[0].mxu0 %vm113_vm3, %v23_v20 }
  0x85   :  { %v191_v23 = vpop.permute.xlu0 %190 }
  0x89   :  { %v198_v28 = vpop.permute.xlu0 %197 }
  0xd7   :  { %v109_v21 = vpop.f32.mrb[0].mxu1 }
  0xd8   :  { %v226_v22 = vpop.f32.mrb[1].mxu1 }
  0xe8   :  { %v183_v24 = vpop.f32.mrb[0].mxu0 }
  0xe9   :  { %v184_v25 = vadd.f32 %v183_v24, %v109_v21  ;;  %v247_v26 = vpop.f32.mrb[1].mxu0 }
  0xeb   :  { %v193_v27 = vmul.f32 %v191_v23, %v184_v25 }
  0xed   :  { %v200_v29 = vadd.f32 %v198_v28, %v193_v27 }
  0xef   :  { %v201_v30 = vmax.f32 %v200_v29, 0.0 }
  0xf1   :  { %202 = vst [vmem:[%s356_s6] sm:$0xff] %v201_v30 }

// kernel: forward.13
= control target key start
LH: loop header
LB: loop body
LE: loop exit
PB: predicated region body
PF: predicated region fallthrough
CT: control target
= control target key end

     0   :  { %v200_v3 = vmov 0   ;;  %vm28_vm0 = vcmask 588800   ;;  %vm140_vm1 = vcmask 261120   ;;  %s279_s1 = inlined_call_operand.vmem [shape: f32[72,32], index: 1, kind: input, shape index: {}]   ;;  %s280_s0 = inlined_call_operand.vmem [shape: f32[16,72], index: 0, kind: input, shape index: {}]   ;;  %s281_s2 = inlined_call_operand.vmem [shape: f32[16,1], index: 2, kind: input, shape index: {}]   ;;  %s282_s3 = inlined_call_operand.vmem [shape: f32[16,1], index: 3, kind: input, shape index: {}]   ;;  %s283_s4 = inlined_call_operand.vmem [shape: f32[16,32], index: 4, kind: output, shape index: {}]  }
   0x1   :  { %v19_v0 = vld [vmem:[%s279_s1] sm:$0xff]  ;;  %v20_v1 = vld [vmem:[%s279_s1 + $0x8] sm:$0xff]  ;;  %v21_v2 = vld [vmem:[%s279_s1 + $0x10] sm:$0xff]  ;;  %198 = vset.pattern.permute.xlu0 %v200_v3  ;;  %199 = vset.pattern.permute.xlu1 %v200_v3 }
   0x2   :  { %v181_v4 = vpack.c.bf16 %v20_v1, %v19_v0  ;;  %v22_v5 = vld [vmem:[%s279_s1 + $0x18] sm:$0xff]  ;;  %v23_v7 = vld [vmem:[%s279_s1 + $0x20] sm:$0xff]  ;;  %v24_v8 = vld [vmem:[%s279_s1 + $0x28] sm:$0xff] }
   0x3   :  { %v185_v6 = vpack.c.bf16 %v22_v5, %v21_v2  ;;  %v17_v9 = vld [vmem:[%s280_s0] sm:$0xff]  ;;  %v189_v12 = vpack.c.bf16 %v24_v8, %v23_v7  ;;  %v25_v13 = vld [vmem:[%s279_s1 + $0x30] sm:$0xff]  ;;  %v26_v14 = vld [vmem:[%s279_s1 + $0x38] sm:$0xff] }
   0x4   :  { %182 = vmatprep.subr.bf16.mxu0 %v181_v4  ;;  %v110_v10 = vld [vmem:[%s281_s2] sm:$0xff]  ;;  %178 = vmatprep.mubr.msk.f32.mxu0 %vm28_vm0, %v17_v9  ;;  %v111_v15 = vld [vmem:[%s281_s2 + $0x8] sm:$0xff]  ;;  %v193_v17 = vpack.c.bf16 %v26_v14, %v25_v13 }
   0x5   :  { %184 = vmatpush3.bf16.msra.mxu0 %v181_v4  ;;  %v124_v11 = vld [vmem:[%s282_s3] sm:$0xff]  ;;  %114 = vperm.xlu0 %198, %v110_v10   ;;  %v125_v16 = vld [vmem:[%s282_s3 + $0x8] sm:$0xff] }
   0x6   :  { %186 = vmatprep.subr.bf16.mxu0 %v185_v6  ;;  %128 = vperm.xlu1 %199, %v124_v11   ;;  %v27_v18 = vld [vmem:[%s279_s1 + $0x40] sm:$0xff]  ;;  %v18_v19 = vld [vmem:[%s280_s0 + $0x8] sm:$0xff] }
   0x9   :  { %188 = vmatpush3.bf16.msra.mxu0 %v185_v6  ;;  %119 = vperm.xlu0 %198, %v111_v15  }
   0xa   :  { %190 = vmatprep.subr.bf16.mxu0 %v189_v12  ;;  %133 = vperm.xlu1 %199, %v125_v16  }
   0xd   :  { %192 = vmatpush3.bf16.msra.mxu0 %v189_v12 }
   0xe   :  { %194 = vmatprep.subr.bf16.mxu0 %v193_v17 }
  0x11   :  { %196 = vmatpush3.bf16.msra.mxu0 %v193_v17 }
  0x12   :  { %176 = vmatprep.subr.mxu0 %v27_v18 }
  0x15   :  { %177 = vmatpush3.msra.mxu0 %v27_v18 }
  0x16   :  { %179 = vmatmul.mubr.msk.f32.vlgmr.msra.gmra.mrb[0].mxu0 %vm28_vm0, %v18_v19 }
  0x84   :  { %v115_v20 = vpop.permute.xlu0 %114 }
  0x85   :  { %v129_v21 = vpop.permute.xlu1 %128 }
  0x88   :  { %v120_v22 = vpop.permute.xlu0 %119 }
  0x89   :  { %v134_v26 = vpop.permute.xlu1 %133 }
  0xe9   :  { %v180_v23 = vpop.f32.mrb[0].mxu0 }
  0xea   :  { %v123_v24 = vmul.f32 %v180_v23, %v120_v22  ;;  %v101_v25 = vpop.f32.mrb[1].mxu0 }
  0xeb   :  { %v122_v27 = vmul.f32 %v115_v20, %v101_v25 }
  0xec   :  { %v137_v28 = vadd.f32 %v134_v26, %v123_v24 }
  0xed   :  { %v136_v29 = vadd.f32 %v129_v21, %v122_v27 }
  0xee   :  { %v139_v30 = vmax.f32 %v137_v28, 0.0 }
  0xef   :  { %v138_v31 = vmax.f32 %v136_v29, 0.0 }
  0xf0   :  { %142 = vst.msk [vmem:[%s283_s4 + $0x8] sm:$0xff] %vm140_vm1, %v139_v30 }
  0xf1   :  { %141 = vst.msk [vmem:[%s283_s4] sm:$0xff] %vm140_vm1, %v138_v31 }

// kernel: forward.14
= control target key start
LH: loop header
LB: loop body
LE: loop exit
PB: predicated region body
PF: predicated region fallthrough
CT: control target
= control target key end

     0   :  { %vm48_vm0 = vcmask 64512   ;;  %v310_v3 = vmov 0.0|0.0   ;;  %v311_v4 = vmov 0   ;;  %vm130_vm1 = vcmask 130048   ;;  %s460_s3 = inlined_call_operand.vmem [shape: f32[8,32], index: 3, kind: input, shape index: {}]   ;;  %s461_s2 = inlined_call_operand.vmem [shape: f32[16,8], index: 2, kind: input, shape index: {}]   ;;  %s462_s1 = inlined_call_operand.vmem [shape: f32[144,32], index: 1, kind: input, shape index: {}]   ;;  %s463_s0 = inlined_call_operand.vmem [shape: f32[16,144], index: 0, kind: input, shape index: {}]   ;;  %s464_s4 = inlined_call_operand.vmem [shape: f32[16,1], index: 4, kind: input, shape index: {}]   ;;  %s465_s5 = inlined_call_operand.vmem [shape: f32[16,1], index: 5, kind: input, shape index: {}]   ;;  %s466_s6 = inlined_call_operand.vmem [shape: f32[16,32], index: 6, kind: output, shape index: {}]  }
   0x1   :  { %v47_v0 = vld [vmem:[%s460_s3] sm:$0xff]  ;;  %v46_v2 = vld [vmem:[%s461_s2 + $0x8] sm:$0xff]  ;;  %288 = vmatprep.subr.bf16.mxu1 %v310_v3  ;;  %308 = vset.pattern.permute.xlu0 %v311_v4  ;;  %v29_v7 = vld [vmem:[%s462_s1 + $0x10] sm:$0xff]  ;;  %vm242_vm2 = vcmask 261120  }
   0x2   :  { %v45_v1 = vld [vmem:[%s461_s2] sm:$0xff]  ;;  %256 = vmatprep.subr.mxu0 %v47_v0  ;;  %v28_v6 = vld [vmem:[%s462_s1 + $0x8] sm:$0xff]  ;;  %v30_v9 = vld [vmem:[%s462_s1 + $0x18] sm:$0xff]  ;;  %309 = vset.pattern.permute.xlu1 %v311_v4 }
   0x3   :  { %258 = vmatprep.mubr.msk.f32.mxu0 %vm48_vm0, %v45_v1  ;;  %v27_v5 = vld [vmem:[%s462_s1] sm:$0xff]  ;;  %257 = vmatpush3.msra.mxu0 %v47_v0  ;;  %v265_v10 = vpack.c.bf16 %v30_v9, %v29_v7  ;;  %v32_v12 = vld [vmem:[%s462_s1 + $0x28] sm:$0xff]  ;;  %v26_v13 = vld [vmem:[%s463_s0 + $0x18] sm:$0xff] }
   0x4   :  { %v262_v8 = vpack.c.bf16 %v28_v6, %v27_v5  ;;  %259 = vmatmul.mubr.msk.f32.vlgmr.msra.gmra.mrb[0].mxu0 %vm48_vm0, %v46_v2  ;;  %261 = vmatprep.subr.bf16.mxu0 %v310_v3  ;;  %v31_v11 = vld [vmem:[%s462_s1 + $0x20] sm:$0xff]  ;;  %v24_v14 = vld [vmem:[%s463_s0 + $0x8] sm:$0xff]  ;;  %v33_v18 = vld [vmem:[%s462_s1 + $0x30] sm:$0xff] }
   0x5   :  { %v268_v15 = vpack.c.bf16 %v32_v12, %v31_v11  ;;  %v212_v16 = vld [vmem:[%s464_s4] sm:$0xff]  ;;  %v34_v19 = vld [vmem:[%s462_s1 + $0x38] sm:$0xff]  ;;  %252 = vmatprep.mubr.msk.f32.mxu1 %vm130_vm1, %v26_v13  ;;  %251 = vmatprep.mubr.msk.f32.mxu0 %vm130_vm1, %v24_v14  ;;  %v213_v21 = vld [vmem:[%s464_s4 + $0x8] sm:$0xff] }
   0x6   :  { %297 = vmatpush1.bf16.msra.mxu1 %v262_v8  ;;  %263 = vmatpush1.bf16.msra.mxu0 %v262_v8  ;;  %v226_v17 = vld [vmem:[%s465_s5] sm:$0xff]  ;;  %v271_v20 = vpack.c.bf16 %v34_v19, %v33_v18  ;;  %v227_v22 = vld [vmem:[%s465_s5 + $0x8] sm:$0xff]  ;;  %v37_v26 = vld [vmem:[%s462_s1 + $0x50] sm:$0xff] }
   0x7   :  { %289 = vmatprep.subr.bf16.mxu1 %v310_v3  ;;  %264 = vmatprep.subr.bf16.mxu0 %v310_v3  ;;  %v35_v23 = vld [vmem:[%s462_s1 + $0x40] sm:$0xff]  ;;  %v36_v24 = vld [vmem:[%s462_s1 + $0x48] sm:$0xff]  ;;  %v38_v27 = vld [vmem:[%s462_s1 + $0x58] sm:$0xff] }
   0x8   :  { %216 = vperm.xlu0 %308, %v212_v16   ;;  %230 = vperm.xlu1 %309, %v226_v17   ;;  %v274_v25 = vpack.c.bf16 %v36_v24, %v35_v23  ;;  %v277_v28 = vpack.c.bf16 %v38_v27, %v37_v26  ;;  %v39_v29 = vld [vmem:[%s462_s1 + $0x60] sm:$0xff]  ;;  %v40_v30 = vld [vmem:[%s462_s1 + $0x68] sm:$0xff]  ;;  %v41_v32 = vld [vmem:[%s462_s1 + $0x70] sm:$0xff] }
   0x9   :  { %v280_v31 = vpack.c.bf16 %v40_v30, %v39_v29  ;;  %v42_v33 = vld [vmem:[%s462_s1 + $0x78] sm:$0xff]  ;;  %v43_v35 = vld [vmem:[%s462_s1 + $0x80] sm:$0xff]  ;;  %v44_v36 = vld [vmem:[%s462_s1 + $0x88] sm:$0xff] }
   0xa   :  { %298 = vmatpush1.bf16.msra.mxu1 %v265_v10  ;;  %266 = vmatpush1.bf16.msra.mxu0 %v265_v10  ;;  %v283_v34 = vpack.c.bf16 %v42_v33, %v41_v32  ;;  %v286_v37 = vpack.c.bf16 %v44_v36, %v43_v35  ;;  %v25_v38 = vld [vmem:[%s463_s0 + $0x10] sm:$0xff]  ;;  %v23_v39 = vld [vmem:[%s463_s0] sm:$0xff] }
   0xb   :  { %290 = vmatprep.subr.bf16.mxu1 %v310_v3  ;;  %267 = vmatprep.subr.bf16.mxu0 %v310_v3 }
   0xc   :  { %221 = vperm.xlu0 %308, %v213_v21   ;;  %235 = vperm.xlu1 %309, %v227_v22  }
   0xe   :  { %299 = vmatpush1.bf16.msra.mxu1 %v268_v15  ;;  %269 = vmatpush1.bf16.msra.mxu0 %v268_v15 }
   0xf   :  { %291 = vmatprep.subr.bf16.mxu1 %v310_v3  ;;  %270 = vmatprep.subr.bf16.mxu0 %v310_v3 }
  0x12   :  { %300 = vmatpush1.bf16.msra.mxu1 %v271_v20  ;;  %272 = vmatpush1.bf16.msra.mxu0 %v271_v20 }
  0x13   :  { %292 = vmatprep.subr.bf16.mxu1 %v310_v3  ;;  %273 = vmatprep.subr.bf16.mxu0 %v310_v3 }
  0x16   :  { %301 = vmatpush1.bf16.msra.mxu1 %v274_v25  ;;  %275 = vmatpush1.bf16.msra.mxu0 %v274_v25 }
  0x17   :  { %293 = vmatprep.subr.bf16.mxu1 %v310_v3  ;;  %276 = vmatprep.subr.bf16.mxu0 %v310_v3 }
  0x1a   :  { %302 = vmatpush1.bf16.msra.mxu1 %v277_v28  ;;  %278 = vmatpush1.bf16.msra.mxu0 %v277_v28 }
  0x1b   :  { %294 = vmatprep.subr.bf16.mxu1 %v310_v3  ;;  %279 = vmatprep.subr.bf16.mxu0 %v310_v3 }
  0x1e   :  { %303 = vmatpush1.bf16.msra.mxu1 %v280_v31  ;;  %281 = vmatpush1.bf16.msra.mxu0 %v280_v31 }
  0x1f   :  { %295 = vmatprep.subr.bf16.mxu1 %v310_v3  ;;  %282 = vmatprep.subr.bf16.mxu0 %v310_v3 }
  0x22   :  { %304 = vmatpush1.bf16.msra.mxu1 %v283_v34  ;;  %284 = vmatpush1.bf16.msra.mxu0 %v283_v34 }
  0x23   :  { %296 = vmatprep.subr.bf16.mxu1 %v310_v3  ;;  %285 = vmatprep.subr.bf16.mxu0 %v310_v3 }
  0x26   :  { %305 = vmatpush1.bf16.msra.mxu1 %v286_v37  ;;  %287 = vmatpush1.bf16.msra.mxu0 %v286_v37 }
  0x29   :  { %207 = vmatmul.mubr.f32.vlgmr.msra.gmra.mrb[0].mxu1 %v25_v38  ;;  %202 = vmatmul.mubr.f32.vlgmr.msra.gmra.mrb[2].mxu0 %v23_v39 }
  0x87   :  { %v217_v42 = vpop.permute.xlu0 %216  ;;  %v231_v43 = vpop.permute.xlu1 %230 }
  0x8b   :  { %v222_v50 = vpop.permute.xlu0 %221  ;;  %v236_v53 = vpop.permute.xlu1 %235 }
  0xd7   :  { %v260_v40 = vpop.f32.mrb[0].mxu0 }
  0xd8   :  { %v121_v41 = vpop.f32.mrb[1].mxu0 }
  0xfc   :  { %v208_v44 = vpop.f32.mrb[0].mxu1  ;;  %v203_v45 = vpop.f32.mrb[2].mxu0 }
  0xfd   :  { %v209_v46 = vadd.f32 %v260_v40, %v208_v44  ;;  %v204_v47 = vadd.f32 %v203_v45, %v121_v41  ;;  %v210_v48 = vpop.f32.mrb[1].mxu1  ;;  %v205_v49 = vpop.f32.mrb[3].mxu0 }
  0xff   :  { %v225_v51 = vmul.f32 %v222_v50, %v209_v46  ;;  %v224_v52 = vmul.f32 %v217_v42, %v204_v47 }
 0x101   :  { %v239_v54 = vadd.f32 %v236_v53, %v225_v51  ;;  %v238_v55 = vadd.f32 %v231_v43, %v224_v52 }
 0x103   :  { %v241_v56 = vmax.f32 %v239_v54, 0.0  ;;  %v240_v57 = vmax.f32 %v238_v55, 0.0 }
 0x105   :  { %244 = vst.msk [vmem:[%s466_s6 + $0x8] sm:$0xff] %vm242_vm2, %v241_v56  ;;  %243 = vst.msk [vmem:[%s466_s6] sm:$0xff] %vm242_vm2, %v240_v57 }

// kernel: forward.15
= control target key start
LH: loop header
LB: loop body
LE: loop exit
PB: predicated region body
PF: predicated region fallthrough
CT: control target
= control target key end

     0   :  { %vm23_vm0 = vcmask 261120   ;;  %vm119_vm1 = vcmask 130048   ;;  %v255_v9 = vmov 0   ;;  %vm203_vm2 = vcmask 9216   ;;  %s319_s1 = inlined_call_operand.vmem [shape: f32[32,2], index: 1, kind: input, shape index: {}]   ;;  %s320_s0 = inlined_call_operand.vmem [shape: f32[16,32], index: 0, kind: input, shape index: {}]   ;;  %s321_s2 = inlined_call_operand.vmem [shape: f32[10,16], index: 2, kind: input, shape index: {}]   ;;  %s322_s3 = inlined_call_operand.vmem [shape: f32[10,1], index: 3, kind: input, shape index: {}]   ;;  %s323_s4 = inlined_call_operand.vmem [shape: f32[10,2], index: 4, kind: output, shape index: {}]  }
   0x1   :  { %v19_v0 = vld [vmem:[%s319_s1] sm:$0xff]  ;;  %v20_v1 = vld [vmem:[%s319_s1 + $0x8] sm:$0xff]  ;;  %v21_v2 = vld [vmem:[%s319_s1 + $0x10] sm:$0xff]  ;;  %254 = vset.pattern.permute.xlu0 %v255_v9  ;;  %vm201_vm3 = vcmask 15360  }
   0x2   :  { %v241_v3 = vpack.c.bf16 %v20_v1, %v19_v0  ;;  %v22_v4 = vld [vmem:[%s319_s1 + $0x18] sm:$0xff]  ;;  %v17_v5 = vld [vmem:[%s320_s0] sm:$0xff]  ;;  %v18_v7 = vld [vmem:[%s320_s0 + $0x8] sm:$0xff] }
   0x3   :  { %v245_v6 = vpack.c.bf16 %v22_v4, %v21_v2  ;;  %231 = vmatprep.mubr.msk.f32.mxu0 %vm23_vm0, %v17_v5  ;;  %v105_v8 = vld [vmem:[%s321_s2] sm:$0xff]  ;;  %v108_v11 = vld [vmem:[%s322_s3 + $0x8] sm:$0x3] }
   0x4   :  { %242 = vmatprep.subr.bf16.mxu0 %v241_v3  ;;  %238 = vmatprep.mubr.msk.f32.mxu1 %vm119_vm1, %v105_v8  ;;  %v107_v10 = vld [vmem:[%s322_s3] sm:$0xff]  ;;  %v106_v15 = vld [vmem:[%s321_s2 + $0x8] sm:$0x3] }
   0x5   :  { %244 = vmatpush3.bf16.msra.mxu0 %v241_v3  ;;  %111 = vperm.xlu0 %254, %v107_v10  }
   0x6   :  { %246 = vmatprep.subr.bf16.mxu0 %v245_v6 }
   0x9   :  { %248 = vmatpush3.bf16.msra.mxu0 %v245_v6  ;;  %116 = vperm.xlu0 %254, %v108_v11  }
   0xc   :  { %232 = vmatmul.mubr.msk.f32.vlgmr.msra.gmra.mrb[0].mxu0 %vm23_vm0, %v18_v7 }
  0x84   :  { %v112_v16 = vpop.permute.xlu0 %111 }
  0x88   :  { %v117_v17 = vpop.permute.xlu0 %116 }
  0xdf   :  { %v233_v12 = vpop.f32.mrb[0].mxu0 }
  0xe0   :  { %v96_v13 = vpop.f32.mrb[1].mxu0 }
  0xe1   :  { %v249_v14 = vpack.c.bf16 %v233_v12, %v96_v13 }
  0xe3   :  { %250 = vmatprep.subr.bf16.mxu1 %v249_v14 }
  0xe4   :  { %252 = vmatpush3.bf16.msra.mxu1 %v249_v14 }
  0xe7   :  { %239 = vmatmul.mubr.msk.f32.vlgmr.msra.gmra.mrb[0].mxu1 %vm119_vm1, %v106_v15 }
 0x1ba   :  { %v240_v18 = vpop.f32.mrb[0].mxu1 }
 0x1bb   :  { %v198_v19 = vadd.f32 %v240_v18, %v117_v17  ;;  %v192_v20 = vpop.f32.mrb[1].mxu1 }
 0x1bc   :  { %v193_v21 = vadd.f32 %v192_v20, %v112_v16 }
 0x1bd   :  { %204 = vst.msk [vmem:[%s323_s4 + $0x8] sm:$0x3] %vm203_vm2, %v198_v19 }
 0x1be   :  { %202 = vst.msk [vmem:[%s323_s4] sm:$0xff] %vm201_vm3, %v193_v21 }

</bundles_post_ra>
